<compile_context>
chip_gen: v5e
topology: v5e:2x2
jax: 0.10.0
libtpu: 0.0.40
codegen_flags: <defaults>
</compile_context>

<pallas_src>
import math

import jax
import jax.numpy as jnp
from jax.experimental import pallas as pl
from jax.experimental.pallas import tpu as pltpu  # noqa: F401  (kept for TPU-specific tuning)

BETA = 0.1        # LeakyBase default
THRESHOLD = 1.0   # LeakyBase default


def _leaky_three_layer_kernel(x_ref, w1_ref, b1_ref, w2_ref, b2_ref,
                              w3_ref, b3_ref, o_ref):
    B, T, _ = x_ref.shape
    H = w2_ref.shape[0]
    n_out = w3_ref.shape[1]
    f32 = jnp.float32

    # ---- fc1 hoisted out of the time loop: one batched MXU matmul ----------
    # (B, T, K) @ (K, H) -> (B, T, H); weight pushed to the MXU once per batch
    # row instead of once per timestep; bias added once.
    w1_b = jnp.broadcast_to(w1_ref[...], (B,) + w1_ref.shape)          # (B, K, H)
    cur1_all = jnp.einsum("btk,bkh->bth", x_ref[...], w1_b,
                          preferred_element_type=f32) + b1_ref[...]    # (B, T, H)

    w2 = w2_ref[...]
    b2 = b2_ref[...]
    w3 = w3_ref[...]
    b3 = b3_ref[...]

    mem1 = jnp.zeros((B, H), f32)
    mem2 = jnp.zeros((B, H), f32)
    mem3 = jnp.zeros((B, n_out), f32)
    acc = jnp.zeros((B, n_out), f32)

    # ---- LIF recurrence: statically unrolled (T is small & static), so all
    # time indexing is static slicing and the state lives in vregs. fc2/fc3
    # cannot be hoisted (they consume spikes from the previous layer at t).
    for t in range(T):
        # layer 1
        reset1 = (mem1 - THRESHOLD > 0.0).astype(f32)
        mem1 = BETA * mem1 + cur1_all[:, t, :] - reset1 * THRESHOLD
        spk1 = (mem1 - THRESHOLD > 0.0).astype(f32)
        # layer 2
        cur2 = jnp.dot(spk1, w2, preferred_element_type=f32) + b2
        reset2 = (mem2 - THRESHOLD > 0.0).astype(f32)
        mem2 = BETA * mem2 + cur2 - reset2 * THRESHOLD
        spk2 = (mem2 - THRESHOLD > 0.0).astype(f32)
        # layer 3
        cur3 = jnp.dot(spk2, w3, preferred_element_type=f32) + b3
        reset3 = (mem3 - THRESHOLD > 0.0).astype(f32)
        mem3 = BETA * mem3 + cur3 - reset3 * THRESHOLD
        spk3 = (mem3 - THRESHOLD > 0.0).astype(f32)

        acc = acc + spk3

    # ---- softmax over the class dim (PyTorch dim=1) -------------------------
    s = acc - jnp.max(acc, axis=-1, keepdims=True)
    e = jnp.exp(s)
    inv = pl.reciprocal(jnp.sum(e, axis=-1, keepdims=True), approx=True)
    o_ref[...] = e * inv


@jax.jit
def leaky_three_layer_forward(x, w1, b1, w2, b2, w3, b3):
    """x: [B, T, N_in]; w_l: [out_l, in_l]; b_l: [out_l] -> softmax probs [B, N_out]."""
    B, T, N_in = x.shape
    H = w1.shape[0]
    N_out = w3.shape[0]

    x = x.astype(jnp.float32)                     # NO transpose of x (kernel takes it as-is)
    w1t = w1.astype(jnp.float32).T                # (N_in, H)  tiny, one-time
    w2t = w2.astype(jnp.float32).T                # (H, H)
    w3t = w3.astype(jnp.float32).T                # (H, N_out)
    b1r = b1.astype(jnp.float32).reshape(1, 1, H)
    b2r = b2.astype(jnp.float32).reshape(1, H)
    b3r = b3.astype(jnp.float32).reshape(1, N_out)

    # Single invocation; every array is a full-size VMEM block (x is ~50 KB at
    # the module's default sizes, far under any scoped-VMEM limit).
    # TODO(synk): for large B, tile B over a "parallel" grid axis (multiples of
    # 8 sublanes), pad N_out to 128 lanes for unmasked stores, cast x/W1 to
    # bf16 on v6e/v7x, and re-derive the VMEM budget for v7x's 64 MiB.
    return pl.pallas_call(
        _leaky_three_layer_kernel,
        out_shape=jax.ShapeDtypeStruct((B, N_out), jnp.float32),
    )(x, w1t, b1r, w2t, b2r, w3t, b3r)


def _reference_forward(x, w1, b1, w2, b2, w3, b3):
    """Pure-JAX reference of LeakyThreeLayer.forward."""
    B, T, _ = x.shape
    H = w1.shape[0]
    N_out = w3.shape[0]
    f32 = jnp.float32
    hp = jax.lax.Precision.HIGHEST

    cur1_all = jnp.einsum("btk,hk->bth", x, w1, precision=hp) + b1
    mem1 = jnp.zeros((B, H), f32)
    mem2 = jnp.zeros((B, H), f32)
    mem3 = jnp.zeros((B, N_out), f32)
    acc = jnp.zeros((B, N_out), f32)
    for t in range(T):
        reset1 = (mem1 - THRESHOLD > 0.0).astype(f32)
        mem1 = BETA * mem1 + cur1_all[:, t, :] - reset1 * THRESHOLD
        spk1 = (mem1 - THRESHOLD > 0.0).astype(f32)

        cur2 = jnp.dot(spk1, w2.T, precision=hp) + b2
        reset2 = (mem2 - THRESHOLD > 0.0).astype(f32)
        mem2 = BETA * mem2 + cur2 - reset2 * THRESHOLD
        spk2 = (mem2 - THRESHOLD > 0.0).astype(f32)

        cur3 = jnp.dot(spk2, w3.T, precision=hp) + b3
        reset3 = (mem3 - THRESHOLD > 0.0).astype(f32)
        mem3 = BETA * mem3 + cur3 - reset3 * THRESHOLD
        spk3 = (mem3 - THRESHOLD > 0.0).astype(f32)

        acc = acc + spk3
    return jax.nn.softmax(acc, axis=1)


if __name__ == "__main__":
    # Module defaults: num_inputs = 28*28 = 784, num_hidden = 10, num_outputs = 10.
    B, T, N_IN, H, N_OUT = 2, 8, 784, 10, 10

    key = jax.random.PRNGKey(0)
    kx, k1w, k1b, k2w, k2b, k3w, k3b = jax.random.split(key, 7)

    # fc1: nn.Linear-style init (uniform +/- 1/sqrt(fan_in)).
    bound1 = 1.0 / math.sqrt(N_IN)
    w1 = jax.random.uniform(k1w, (H, N_IN), jnp.float32, -bound1, bound1)
    b1 = jax.random.uniform(k1b, (H,), jnp.float32, -bound1, bound1)
    # fc2/fc3: weights scaled up so the deeper LIF layers actually spike in this
    # smoke test (parameter choice only; the math is unchanged).
    w2 = jax.random.uniform(k2w, (H, H), jnp.float32, -1.0, 1.0)
    b2 = jax.random.uniform(k2b, (H,), jnp.float32, -0.5, 0.5)
    w3 = jax.random.uniform(k3w, (N_OUT, H), jnp.float32, -1.0, 1.0)
    b3 = jax.random.uniform(k3b, (N_OUT,), jnp.float32, -0.5, 0.5)

    # Inputs scaled so the layer-1 membrane crosses threshold and spikes fire.
    x = jax.random.uniform(kx, (B, T, N_IN), jnp.float32, 0.0, 4.0)

    out = leaky_three_layer_forward(x, w1, b1, w2, b2, w3, b3)
    out = jax.block_until_ready(out)

    ref = _reference_forward(x, w1, b1, w2, b2, w3, b3)
    assert out.shape == (B, N_OUT)
    # approx-reciprocal softmax denominator => ~1e-4-level deviation allowed
    assert jnp.allclose(out, ref, atol=2e-3, rtol=2e-3), (out, ref)
    assert jnp.allclose(jnp.sum(out, axis=1), 1.0, atol=2e-3)

    print("KERNEL_OK")
</pallas_src>

<mosaic_0001>
module attributes {stable_mosaic.version = 11 : i64} {
  func.func @_leaky_three_layer_kernel(%arg0: memref<2x8x784xf32, #tpu.memory_space<vmem>>, %arg1: memref<784x10xf32, #tpu.memory_space<vmem>>, %arg2: memref<1x1x10xf32, #tpu.memory_space<vmem>>, %arg3: memref<10x10xf32, #tpu.memory_space<vmem>>, %arg4: memref<1x10xf32, #tpu.memory_space<vmem>>, %arg5: memref<10x10xf32, #tpu.memory_space<vmem>>, %arg6: memref<1x10xf32, #tpu.memory_space<vmem>>, %arg7: memref<2x10xf32, #tpu.memory_space<vmem>>) attributes {dimension_semantics = [], scalar_prefetch = 0 : i64, scratch_operands = 0 : i64, tpu.core_type = #tpu.core_type<tc>} {
    %c0 = arith.constant 0 : index
    %c0_0 = arith.constant 0 : index
    %0 = vector.load %arg1[%c0, %c0_0] : memref<784x10xf32, #tpu.memory_space<vmem>>, vector<784x10xf32>
    %1 = vector.shape_cast %0 : vector<784x10xf32> to vector<1x784x10xf32>
    %2 = vector.broadcast %1 : vector<1x784x10xf32> to vector<2x784x10xf32>
    %c0_1 = arith.constant 0 : index
    %c0_2 = arith.constant 0 : index
    %c0_3 = arith.constant 0 : index
    %3 = vector.load %arg0[%c0_1, %c0_2, %c0_3] : memref<2x8x784xf32, #tpu.memory_space<vmem>>, vector<2x8x784xf32>
    "tpu.trace_start"() <{level = 10 : i32, message = "btk,bkh->bth"}> : () -> ()
    %cst = arith.constant dense<0.000000e+00> : vector<2x8x10xf32>
    %4 = tpu.matmul %3, %2, %cst {dimension_numbers = #tpu.dot_dimension_numbers<[2], [1], [1], [2], [0, 0, 0, 1, 1, 2], [0], [0]>} : vector<2x8x784xf32>, vector<2x784x10xf32>, vector<2x8x10xf32> -> vector<2x8x10xf32>
    "tpu.trace_stop"() : () -> ()
    %c0_4 = arith.constant 0 : index
    %c0_5 = arith.constant 0 : index
    %c0_6 = arith.constant 0 : index
    %5 = vector.load %arg2[%c0_4, %c0_5, %c0_6] : memref<1x1x10xf32, #tpu.memory_space<vmem>>, vector<1x1x10xf32>
    %6 = vector.broadcast %5 : vector<1x1x10xf32> to vector<2x8x10xf32>
    %7 = arith.addf %4, %6 : vector<2x8x10xf32>
    %c0_7 = arith.constant 0 : index
    %c0_8 = arith.constant 0 : index
    %8 = vector.load %arg3[%c0_7, %c0_8] : memref<10x10xf32, #tpu.memory_space<vmem>>, vector<10x10xf32>
    %c0_9 = arith.constant 0 : index
    %c0_10 = arith.constant 0 : index
    %9 = vector.load %arg4[%c0_9, %c0_10] : memref<1x10xf32, #tpu.memory_space<vmem>>, vector<1x10xf32>
    %c0_11 = arith.constant 0 : index
    %c0_12 = arith.constant 0 : index
    %10 = vector.load %arg5[%c0_11, %c0_12] : memref<10x10xf32, #tpu.memory_space<vmem>>, vector<10x10xf32>
    %c0_13 = arith.constant 0 : index
    %c0_14 = arith.constant 0 : index
    %11 = vector.load %arg6[%c0_13, %c0_14] : memref<1x10xf32, #tpu.memory_space<vmem>>, vector<1x10xf32>
    %cst_15 = arith.constant 0.000000e+00 : f32
    %12 = vector.broadcast %cst_15 : f32 to vector<2x10xf32>
    %cst_16 = arith.constant 0.000000e+00 : f32
    %13 = vector.broadcast %cst_16 : f32 to vector<2x10xf32>
    %cst_17 = arith.constant 0.000000e+00 : f32
    %14 = vector.broadcast %cst_17 : f32 to vector<2x10xf32>
    %cst_18 = arith.constant 0.000000e+00 : f32
    %15 = vector.broadcast %cst_18 : f32 to vector<2x10xf32>
    %cst_19 = arith.constant 1.000000e+00 : f32
    %16 = vector.broadcast %cst_19 : f32 to vector<2x10xf32>
    %17 = arith.subf %12, %16 : vector<2x10xf32>
    %cst_20 = arith.constant 0.000000e+00 : f32
    %18 = vector.broadcast %cst_20 : f32 to vector<2x10xf32>
    %19 = arith.cmpf ogt, %17, %18 : vector<2x10xf32>
    %20 = arith.extui %19 : vector<2x10xi1> to vector<2x10xi32>
    %21 = arith.sitofp %20 : vector<2x10xi32> to vector<2x10xf32>
    %cst_21 = arith.constant 1.000000e-01 : f32
    %22 = vector.broadcast %cst_21 : f32 to vector<2x10xf32>
    %23 = arith.mulf %22, %12 : vector<2x10xf32>
    %24 = vector.extract_strided_slice %7 {offsets = [0, 0, 0], sizes = [2, 1, 10], strides = [1, 1, 1]} : vector<2x8x10xf32> to vector<2x1x10xf32>
    %25 = vector.shape_cast %24 : vector<2x1x10xf32> to vector<2x10xf32>
    %26 = arith.addf %23, %25 : vector<2x10xf32>
    %cst_22 = arith.constant 1.000000e+00 : f32
    %27 = vector.broadcast %cst_22 : f32 to vector<2x10xf32>
    %28 = arith.mulf %21, %27 : vector<2x10xf32>
    %29 = arith.subf %26, %28 : vector<2x10xf32>
    %cst_23 = arith.constant 1.000000e+00 : f32
    %30 = vector.broadcast %cst_23 : f32 to vector<2x10xf32>
    %31 = arith.subf %29, %30 : vector<2x10xf32>
    %cst_24 = arith.constant 0.000000e+00 : f32
    %32 = vector.broadcast %cst_24 : f32 to vector<2x10xf32>
    %33 = arith.cmpf ogt, %31, %32 : vector<2x10xf32>
    %34 = arith.extui %33 : vector<2x10xi1> to vector<2x10xi32>
    %35 = arith.sitofp %34 : vector<2x10xi32> to vector<2x10xf32>
    %cst_25 = arith.constant dense<0.000000e+00> : vector<2x10xf32>
    %36 = tpu.matmul %35, %8, %cst_25 {dimension_numbers = #tpu.dot_dimension_numbers<[1], [0], [0], [1], [0, 0, 1, 1], [], []>} : vector<2x10xf32>, vector<10x10xf32>, vector<2x10xf32> -> vector<2x10xf32>
    %37 = vector.broadcast %9 : vector<1x10xf32> to vector<2x10xf32>
    %38 = arith.addf %36, %37 : vector<2x10xf32>
    %cst_26 = arith.constant 1.000000e+00 : f32
    %39 = vector.broadcast %cst_26 : f32 to vector<2x10xf32>
    %40 = arith.subf %13, %39 : vector<2x10xf32>
    %cst_27 = arith.constant 0.000000e+00 : f32
    %41 = vector.broadcast %cst_27 : f32 to vector<2x10xf32>
    %42 = arith.cmpf ogt, %40, %41 : vector<2x10xf32>
    %43 = arith.extui %42 : vector<2x10xi1> to vector<2x10xi32>
    %44 = arith.sitofp %43 : vector<2x10xi32> to vector<2x10xf32>
    %cst_28 = arith.constant 1.000000e-01 : f32
    %45 = vector.broadcast %cst_28 : f32 to vector<2x10xf32>
    %46 = arith.mulf %45, %13 : vector<2x10xf32>
    %47 = arith.addf %46, %38 : vector<2x10xf32>
    %cst_29 = arith.constant 1.000000e+00 : f32
    %48 = vector.broadcast %cst_29 : f32 to vector<2x10xf32>
    %49 = arith.mulf %44, %48 : vector<2x10xf32>
    %50 = arith.subf %47, %49 : vector<2x10xf32>
    %cst_30 = arith.constant 1.000000e+00 : f32
    %51 = vector.broadcast %cst_30 : f32 to vector<2x10xf32>
    %52 = arith.subf %50, %51 : vector<2x10xf32>
    %cst_31 = arith.constant 0.000000e+00 : f32
    %53 = vector.broadcast %cst_31 : f32 to vector<2x10xf32>
    %54 = arith.cmpf ogt, %52, %53 : vector<2x10xf32>
    %55 = arith.extui %54 : vector<2x10xi1> to vector<2x10xi32>
    %56 = arith.sitofp %55 : vector<2x10xi32> to vector<2x10xf32>
    %cst_32 = arith.constant dense<0.000000e+00> : vector<2x10xf32>
    %57 = tpu.matmul %56, %10, %cst_32 {dimension_numbers = #tpu.dot_dimension_numbers<[1], [0], [0], [1], [0, 0, 1, 1], [], []>} : vector<2x10xf32>, vector<10x10xf32>, vector<2x10xf32> -> vector<2x10xf32>
    %58 = vector.broadcast %11 : vector<1x10xf32> to vector<2x10xf32>
    %59 = arith.addf %57, %58 : vector<2x10xf32>
    %cst_33 = arith.constant 1.000000e+00 : f32
    %60 = vector.broadcast %cst_33 : f32 to vector<2x10xf32>
    %61 = arith.subf %14, %60 : vector<2x10xf32>
    %cst_34 = arith.constant 0.000000e+00 : f32
    %62 = vector.broadcast %cst_34 : f32 to vector<2x10xf32>
    %63 = arith.cmpf ogt, %61, %62 : vector<2x10xf32>
    %64 = arith.extui %63 : vector<2x10xi1> to vector<2x10xi32>
    %65 = arith.sitofp %64 : vector<2x10xi32> to vector<2x10xf32>
    %cst_35 = arith.constant 1.000000e-01 : f32
    %66 = vector.broadcast %cst_35 : f32 to vector<2x10xf32>
    %67 = arith.mulf %66, %14 : vector<2x10xf32>
    %68 = arith.addf %67, %59 : vector<2x10xf32>
    %cst_36 = arith.constant 1.000000e+00 : f32
    %69 = vector.broadcast %cst_36 : f32 to vector<2x10xf32>
    %70 = arith.mulf %65, %69 : vector<2x10xf32>
    %71 = arith.subf %68, %70 : vector<2x10xf32>
    %cst_37 = arith.constant 1.000000e+00 : f32
    %72 = vector.broadcast %cst_37 : f32 to vector<2x10xf32>
    %73 = arith.subf %71, %72 : vector<2x10xf32>
    %cst_38 = arith.constant 0.000000e+00 : f32
    %74 = vector.broadcast %cst_38 : f32 to vector<2x10xf32>
    %75 = arith.cmpf ogt, %73, %74 : vector<2x10xf32>
    %76 = arith.extui %75 : vector<2x10xi1> to vector<2x10xi32>
    %77 = arith.sitofp %76 : vector<2x10xi32> to vector<2x10xf32>
    %78 = arith.addf %15, %77 : vector<2x10xf32>
    %cst_39 = arith.constant 1.000000e+00 : f32
    %79 = vector.broadcast %cst_39 : f32 to vector<2x10xf32>
    %80 = arith.subf %29, %79 : vector<2x10xf32>
    %cst_40 = arith.constant 0.000000e+00 : f32
    %81 = vector.broadcast %cst_40 : f32 to vector<2x10xf32>
    %82 = arith.cmpf ogt, %80, %81 : vector<2x10xf32>
    %83 = arith.extui %82 : vector<2x10xi1> to vector<2x10xi32>
    %84 = arith.sitofp %83 : vector<2x10xi32> to vector<2x10xf32>
    %cst_41 = arith.constant 1.000000e-01 : f32
    %85 = vector.broadcast %cst_41 : f32 to vector<2x10xf32>
    %86 = arith.mulf %85, %29 : vector<2x10xf32>
    %87 = vector.extract_strided_slice %7 {offsets = [0, 1, 0], sizes = [2, 1, 10], strides = [1, 1, 1]} : vector<2x8x10xf32> to vector<2x1x10xf32>
    %88 = vector.shape_cast %87 : vector<2x1x10xf32> to vector<2x10xf32>
    %89 = arith.addf %86, %88 : vector<2x10xf32>
    %cst_42 = arith.constant 1.000000e+00 : f32
    %90 = vector.broadcast %cst_42 : f32 to vector<2x10xf32>
    %91 = arith.mulf %84, %90 : vector<2x10xf32>
    %92 = arith.subf %89, %91 : vector<2x10xf32>
    %cst_43 = arith.constant 1.000000e+00 : f32
    %93 = vector.broadcast %cst_43 : f32 to vector<2x10xf32>
    %94 = arith.subf %92, %93 : vector<2x10xf32>
    %cst_44 = arith.constant 0.000000e+00 : f32
    %95 = vector.broadcast %cst_44 : f32 to vector<2x10xf32>
    %96 = arith.cmpf ogt, %94, %95 : vector<2x10xf32>
    %97 = arith.extui %96 : vector<2x10xi1> to vector<2x10xi32>
    %98 = arith.sitofp %97 : vector<2x10xi32> to vector<2x10xf32>
    %cst_45 = arith.constant dense<0.000000e+00> : vector<2x10xf32>
    %99 = tpu.matmul %98, %8, %cst_45 {dimension_numbers = #tpu.dot_dimension_numbers<[1], [0], [0], [1], [0, 0, 1, 1], [], []>} : vector<2x10xf32>, vector<10x10xf32>, vector<2x10xf32> -> vector<2x10xf32>
    %100 = vector.broadcast %9 : vector<1x10xf32> to vector<2x10xf32>
    %101 = arith.addf %99, %100 : vector<2x10xf32>
    %cst_46 = arith.constant 1.000000e+00 : f32
    %102 = vector.broadcast %cst_46 : f32 to vector<2x10xf32>
    %103 = arith.subf %50, %102 : vector<2x10xf32>
    %cst_47 = arith.constant 0.000000e+00 : f32
    %104 = vector.broadcast %cst_47 : f32 to vector<2x10xf32>
    %105 = arith.cmpf ogt, %103, %104 : vector<2x10xf32>
    %106 = arith.extui %105 : vector<2x10xi1> to vector<2x10xi32>
    %107 = arith.sitofp %106 : vector<2x10xi32> to vector<2x10xf32>
    %cst_48 = arith.constant 1.000000e-01 : f32
    %108 = vector.broadcast %cst_48 : f32 to vector<2x10xf32>
    %109 = arith.mulf %108, %50 : vector<2x10xf32>
    %110 = arith.addf %109, %101 : vector<2x10xf32>
    %cst_49 = arith.constant 1.000000e+00 : f32
    %111 = vector.broadcast %cst_49 : f32 to vector<2x10xf32>
    %112 = arith.mulf %107, %111 : vector<2x10xf32>
    %113 = arith.subf %110, %112 : vector<2x10xf32>
    %cst_50 = arith.constant 1.000000e+00 : f32
    %114 = vector.broadcast %cst_50 : f32 to vector<2x10xf32>
    %115 = arith.subf %113, %114 : vector<2x10xf32>
    %cst_51 = arith.constant 0.000000e+00 : f32
    %116 = vector.broadcast %cst_51 : f32 to vector<2x10xf32>
    %117 = arith.cmpf ogt, %115, %116 : vector<2x10xf32>
    %118 = arith.extui %117 : vector<2x10xi1> to vector<2x10xi32>
    %119 = arith.sitofp %118 : vector<2x10xi32> to vector<2x10xf32>
    %cst_52 = arith.constant dense<0.000000e+00> : vector<2x10xf32>
    %120 = tpu.matmul %119, %10, %cst_52 {dimension_numbers = #tpu.dot_dimension_numbers<[1], [0], [0], [1], [0, 0, 1, 1], [], []>} : vector<2x10xf32>, vector<10x10xf32>, vector<2x10xf32> -> vector<2x10xf32>
    %121 = vector.broadcast %11 : vector<1x10xf32> to vector<2x10xf32>
    %122 = arith.addf %120, %121 : vector<2x10xf32>
    %cst_53 = arith.constant 1.000000e+00 : f32
    %123 = vector.broadcast %cst_53 : f32 to vector<2x10xf32>
    %124 = arith.subf %71, %123 : vector<2x10xf32>
    %cst_54 = arith.constant 0.000000e+00 : f32
    %125 = vector.broadcast %cst_54 : f32 to vector<2x10xf32>
    %126 = arith.cmpf ogt, %124, %125 : vector<2x10xf32>
    %127 = arith.extui %126 : vector<2x10xi1> to vector<2x10xi32>
    %128 = arith.sitofp %127 : vector<2x10xi32> to vector<2x10xf32>
    %cst_55 = arith.constant 1.000000e-01 : f32
    %129 = vector.broadcast %cst_55 : f32 to vector<2x10xf32>
    %130 = arith.mulf %129, %71 : vector<2x10xf32>
    %131 = arith.addf %130, %122 : vector<2x10xf32>
    %cst_56 = arith.constant 1.000000e+00 : f32
    %132 = vector.broadcast %cst_56 : f32 to vector<2x10xf32>
    %133 = arith.mulf %128, %132 : vector<2x10xf32>
    %134 = arith.subf %131, %133 : vector<2x10xf32>
    %cst_57 = arith.constant 1.000000e+00 : f32
    %135 = vector.broadcast %cst_57 : f32 to vector<2x10xf32>
    %136 = arith.subf %134, %135 : vector<2x10xf32>
    %cst_58 = arith.constant 0.000000e+00 : f32
    %137 = vector.broadcast %cst_58 : f32 to vector<2x10xf32>
    %138 = arith.cmpf ogt, %136, %137 : vector<2x10xf32>
    %139 = arith.extui %138 : vector<2x10xi1> to vector<2x10xi32>
    %140 = arith.sitofp %139 : vector<2x10xi32> to vector<2x10xf32>
    %141 = arith.addf %78, %140 : vector<2x10xf32>
    %cst_59 = arith.constant 1.000000e+00 : f32
    %142 = vector.broadcast %cst_59 : f32 to vector<2x10xf32>
    %143 = arith.subf %92, %142 : vector<2x10xf32>
    %cst_60 = arith.constant 0.000000e+00 : f32
    %144 = vector.broadcast %cst_60 : f32 to vector<2x10xf32>
    %145 = arith.cmpf ogt, %143, %144 : vector<2x10xf32>
    %146 = arith.extui %145 : vector<2x10xi1> to vector<2x10xi32>
    %147 = arith.sitofp %146 : vector<2x10xi32> to vector<2x10xf32>
    %cst_61 = arith.constant 1.000000e-01 : f32
    %148 = vector.broadcast %cst_61 : f32 to vector<2x10xf32>
    %149 = arith.mulf %148, %92 : vector<2x10xf32>
    %150 = vector.extract_strided_slice %7 {offsets = [0, 2, 0], sizes = [2, 1, 10], strides = [1, 1, 1]} : vector<2x8x10xf32> to vector<2x1x10xf32>
    %151 = vector.shape_cast %150 : vector<2x1x10xf32> to vector<2x10xf32>
    %152 = arith.addf %149, %151 : vector<2x10xf32>
    %cst_62 = arith.constant 1.000000e+00 : f32
    %153 = vector.broadcast %cst_62 : f32 to vector<2x10xf32>
    %154 = arith.mulf %147, %153 : vector<2x10xf32>
    %155 = arith.subf %152, %154 : vector<2x10xf32>
    %cst_63 = arith.constant 1.000000e+00 : f32
    %156 = vector.broadcast %cst_63 : f32 to vector<2x10xf32>
    %157 = arith.subf %155, %156 : vector<2x10xf32>
    %cst_64 = arith.constant 0.000000e+00 : f32
    %158 = vector.broadcast %cst_64 : f32 to vector<2x10xf32>
    %159 = arith.cmpf ogt, %157, %158 : vector<2x10xf32>
    %160 = arith.extui %159 : vector<2x10xi1> to vector<2x10xi32>
    %161 = arith.sitofp %160 : vector<2x10xi32> to vector<2x10xf32>
    %cst_65 = arith.constant dense<0.000000e+00> : vector<2x10xf32>
    %162 = tpu.matmul %161, %8, %cst_65 {dimension_numbers = #tpu.dot_dimension_numbers<[1], [0], [0], [1], [0, 0, 1, 1], [], []>} : vector<2x10xf32>, vector<10x10xf32>, vector<2x10xf32> -> vector<2x10xf32>
    %163 = vector.broadcast %9 : vector<1x10xf32> to vector<2x10xf32>
    %164 = arith.addf %162, %163 : vector<2x10xf32>
    %cst_66 = arith.constant 1.000000e+00 : f32
    %165 = vector.broadcast %cst_66 : f32 to vector<2x10xf32>
    %166 = arith.subf %113, %165 : vector<2x10xf32>
    %cst_67 = arith.constant 0.000000e+00 : f32
    %167 = vector.broadcast %cst_67 : f32 to vector<2x10xf32>
    %168 = arith.cmpf ogt, %166, %167 : vector<2x10xf32>
    %169 = arith.extui %168 : vector<2x10xi1> to vector<2x10xi32>
    %170 = arith.sitofp %169 : vector<2x10xi32> to vector<2x10xf32>
    %cst_68 = arith.constant 1.000000e-01 : f32
    %171 = vector.broadcast %cst_68 : f32 to vector<2x10xf32>
    %172 = arith.mulf %171, %113 : vector<2x10xf32>
    %173 = arith.addf %172, %164 : vector<2x10xf32>
    %cst_69 = arith.constant 1.000000e+00 : f32
    %174 = vector.broadcast %cst_69 : f32 to vector<2x10xf32>
    %175 = arith.mulf %170, %174 : vector<2x10xf32>
    %176 = arith.subf %173, %175 : vector<2x10xf32>
    %cst_70 = arith.constant 1.000000e+00 : f32
    %177 = vector.broadcast %cst_70 : f32 to vector<2x10xf32>
    %178 = arith.subf %176, %177 : vector<2x10xf32>
    %cst_71 = arith.constant 0.000000e+00 : f32
    %179 = vector.broadcast %cst_71 : f32 to vector<2x10xf32>
    %180 = arith.cmpf ogt, %178, %179 : vector<2x10xf32>
    %181 = arith.extui %180 : vector<2x10xi1> to vector<2x10xi32>
    %182 = arith.sitofp %181 : vector<2x10xi32> to vector<2x10xf32>
    %cst_72 = arith.constant dense<0.000000e+00> : vector<2x10xf32>
    %183 = tpu.matmul %182, %10, %cst_72 {dimension_numbers = #tpu.dot_dimension_numbers<[1], [0], [0], [1], [0, 0, 1, 1], [], []>} : vector<2x10xf32>, vector<10x10xf32>, vector<2x10xf32> -> vector<2x10xf32>
    %184 = vector.broadcast %11 : vector<1x10xf32> to vector<2x10xf32>
    %185 = arith.addf %183, %184 : vector<2x10xf32>
    %cst_73 = arith.constant 1.000000e+00 : f32
    %186 = vector.broadcast %cst_73 : f32 to vector<2x10xf32>
    %187 = arith.subf %134, %186 : vector<2x10xf32>
    %cst_74 = arith.constant 0.000000e+00 : f32
    %188 = vector.broadcast %cst_74 : f32 to vector<2x10xf32>
    %189 = arith.cmpf ogt, %187, %188 : vector<2x10xf32>
    %190 = arith.extui %189 : vector<2x10xi1> to vector<2x10xi32>
    %191 = arith.sitofp %190 : vector<2x10xi32> to vector<2x10xf32>
    %cst_75 = arith.constant 1.000000e-01 : f32
    %192 = vector.broadcast %cst_75 : f32 to vector<2x10xf32>
    %193 = arith.mulf %192, %134 : vector<2x10xf32>
    %194 = arith.addf %193, %185 : vector<2x10xf32>
    %cst_76 = arith.constant 1.000000e+00 : f32
    %195 = vector.broadcast %cst_76 : f32 to vector<2x10xf32>
    %196 = arith.mulf %191, %195 : vector<2x10xf32>
    %197 = arith.subf %194, %196 : vector<2x10xf32>
    %cst_77 = arith.constant 1.000000e+00 : f32
    %198 = vector.broadcast %cst_77 : f32 to vector<2x10xf32>
    %199 = arith.subf %197, %198 : vector<2x10xf32>
    %cst_78 = arith.constant 0.000000e+00 : f32
    %200 = vector.broadcast %cst_78 : f32 to vector<2x10xf32>
    %201 = arith.cmpf ogt, %199, %200 : vector<2x10xf32>
    %202 = arith.extui %201 : vector<2x10xi1> to vector<2x10xi32>
    %203 = arith.sitofp %202 : vector<2x10xi32> to vector<2x10xf32>
    %204 = arith.addf %141, %203 : vector<2x10xf32>
    %cst_79 = arith.constant 1.000000e+00 : f32
    %205 = vector.broadcast %cst_79 : f32 to vector<2x10xf32>
    %206 = arith.subf %155, %205 : vector<2x10xf32>
    %cst_80 = arith.constant 0.000000e+00 : f32
    %207 = vector.broadcast %cst_80 : f32 to vector<2x10xf32>
    %208 = arith.cmpf ogt, %206, %207 : vector<2x10xf32>
    %209 = arith.extui %208 : vector<2x10xi1> to vector<2x10xi32>
    %210 = arith.sitofp %209 : vector<2x10xi32> to vector<2x10xf32>
    %cst_81 = arith.constant 1.000000e-01 : f32
    %211 = vector.broadcast %cst_81 : f32 to vector<2x10xf32>
    %212 = arith.mulf %211, %155 : vector<2x10xf32>
    %213 = vector.extract_strided_slice %7 {offsets = [0, 3, 0], sizes = [2, 1, 10], strides = [1, 1, 1]} : vector<2x8x10xf32> to vector<2x1x10xf32>
    %214 = vector.shape_cast %213 : vector<2x1x10xf32> to vector<2x10xf32>
    %215 = arith.addf %212, %214 : vector<2x10xf32>
    %cst_82 = arith.constant 1.000000e+00 : f32
    %216 = vector.broadcast %cst_82 : f32 to vector<2x10xf32>
    %217 = arith.mulf %210, %216 : vector<2x10xf32>
    %218 = arith.subf %215, %217 : vector<2x10xf32>
    %cst_83 = arith.constant 1.000000e+00 : f32
    %219 = vector.broadcast %cst_83 : f32 to vector<2x10xf32>
    %220 = arith.subf %218, %219 : vector<2x10xf32>
    %cst_84 = arith.constant 0.000000e+00 : f32
    %221 = vector.broadcast %cst_84 : f32 to vector<2x10xf32>
    %222 = arith.cmpf ogt, %220, %221 : vector<2x10xf32>
    %223 = arith.extui %222 : vector<2x10xi1> to vector<2x10xi32>
    %224 = arith.sitofp %223 : vector<2x10xi32> to vector<2x10xf32>
    %cst_85 = arith.constant dense<0.000000e+00> : vector<2x10xf32>
    %225 = tpu.matmul %224, %8, %cst_85 {dimension_numbers = #tpu.dot_dimension_numbers<[1], [0], [0], [1], [0, 0, 1, 1], [], []>} : vector<2x10xf32>, vector<10x10xf32>, vector<2x10xf32> -> vector<2x10xf32>
    %226 = vector.broadcast %9 : vector<1x10xf32> to vector<2x10xf32>
    %227 = arith.addf %225, %226 : vector<2x10xf32>
    %cst_86 = arith.constant 1.000000e+00 : f32
    %228 = vector.broadcast %cst_86 : f32 to vector<2x10xf32>
    %229 = arith.subf %176, %228 : vector<2x10xf32>
    %cst_87 = arith.constant 0.000000e+00 : f32
    %230 = vector.broadcast %cst_87 : f32 to vector<2x10xf32>
    %231 = arith.cmpf ogt, %229, %230 : vector<2x10xf32>
    %232 = arith.extui %231 : vector<2x10xi1> to vector<2x10xi32>
    %233 = arith.sitofp %232 : vector<2x10xi32> to vector<2x10xf32>
    %cst_88 = arith.constant 1.000000e-01 : f32
    %234 = vector.broadcast %cst_88 : f32 to vector<2x10xf32>
    %235 = arith.mulf %234, %176 : vector<2x10xf32>
    %236 = arith.addf %235, %227 : vector<2x10xf32>
    %cst_89 = arith.constant 1.000000e+00 : f32
    %237 = vector.broadcast %cst_89 : f32 to vector<2x10xf32>
    %238 = arith.mulf %233, %237 : vector<2x10xf32>
    %239 = arith.subf %236, %238 : vector<2x10xf32>
    %cst_90 = arith.constant 1.000000e+00 : f32
    %240 = vector.broadcast %cst_90 : f32 to vector<2x10xf32>
    %241 = arith.subf %239, %240 : vector<2x10xf32>
    %cst_91 = arith.constant 0.000000e+00 : f32
    %242 = vector.broadcast %cst_91 : f32 to vector<2x10xf32>
    %243 = arith.cmpf ogt, %241, %242 : vector<2x10xf32>
    %244 = arith.extui %243 : vector<2x10xi1> to vector<2x10xi32>
    %245 = arith.sitofp %244 : vector<2x10xi32> to vector<2x10xf32>
    %cst_92 = arith.constant dense<0.000000e+00> : vector<2x10xf32>
    %246 = tpu.matmul %245, %10, %cst_92 {dimension_numbers = #tpu.dot_dimension_numbers<[1], [0], [0], [1], [0, 0, 1, 1], [], []>} : vector<2x10xf32>, vector<10x10xf32>, vector<2x10xf32> -> vector<2x10xf32>
    %247 = vector.broadcast %11 : vector<1x10xf32> to vector<2x10xf32>
    %248 = arith.addf %246, %247 : vector<2x10xf32>
    %cst_93 = arith.constant 1.000000e+00 : f32
    %249 = vector.broadcast %cst_93 : f32 to vector<2x10xf32>
    %250 = arith.subf %197, %249 : vector<2x10xf32>
    %cst_94 = arith.constant 0.000000e+00 : f32
    %251 = vector.broadcast %cst_94 : f32 to vector<2x10xf32>
    %252 = arith.cmpf ogt, %250, %251 : vector<2x10xf32>
    %253 = arith.extui %252 : vector<2x10xi1> to vector<2x10xi32>
    %254 = arith.sitofp %253 : vector<2x10xi32> to vector<2x10xf32>
    %cst_95 = arith.constant 1.000000e-01 : f32
    %255 = vector.broadcast %cst_95 : f32 to vector<2x10xf32>
    %256 = arith.mulf %255, %197 : vector<2x10xf32>
    %257 = arith.addf %256, %248 : vector<2x10xf32>
    %cst_96 = arith.constant 1.000000e+00 : f32
    %258 = vector.broadcast %cst_96 : f32 to vector<2x10xf32>
    %259 = arith.mulf %254, %258 : vector<2x10xf32>
    %260 = arith.subf %257, %259 : vector<2x10xf32>
    %cst_97 = arith.constant 1.000000e+00 : f32
    %261 = vector.broadcast %cst_97 : f32 to vector<2x10xf32>
    %262 = arith.subf %260, %261 : vector<2x10xf32>
    %cst_98 = arith.constant 0.000000e+00 : f32
    %263 = vector.broadcast %cst_98 : f32 to vector<2x10xf32>
    %264 = arith.cmpf ogt, %262, %263 : vector<2x10xf32>
    %265 = arith.extui %264 : vector<2x10xi1> to vector<2x10xi32>
    %266 = arith.sitofp %265 : vector<2x10xi32> to vector<2x10xf32>
    %267 = arith.addf %204, %266 : vector<2x10xf32>
    %cst_99 = arith.constant 1.000000e+00 : f32
    %268 = vector.broadcast %cst_99 : f32 to vector<2x10xf32>
    %269 = arith.subf %218, %268 : vector<2x10xf32>
    %cst_100 = arith.constant 0.000000e+00 : f32
    %270 = vector.broadcast %cst_100 : f32 to vector<2x10xf32>
    %271 = arith.cmpf ogt, %269, %270 : vector<2x10xf32>
    %272 = arith.extui %271 : vector<2x10xi1> to vector<2x10xi32>
    %273 = arith.sitofp %272 : vector<2x10xi32> to vector<2x10xf32>
    %cst_101 = arith.constant 1.000000e-01 : f32
    %274 = vector.broadcast %cst_101 : f32 to vector<2x10xf32>
    %275 = arith.mulf %274, %218 : vector<2x10xf32>
    %276 = vector.extract_strided_slice %7 {offsets = [0, 4, 0], sizes = [2, 1, 10], strides = [1, 1, 1]} : vector<2x8x10xf32> to vector<2x1x10xf32>
    %277 = vector.shape_cast %276 : vector<2x1x10xf32> to vector<2x10xf32>
    %278 = arith.addf %275, %277 : vector<2x10xf32>
    %cst_102 = arith.constant 1.000000e+00 : f32
    %279 = vector.broadcast %cst_102 : f32 to vector<2x10xf32>
    %280 = arith.mulf %273, %279 : vector<2x10xf32>
    %281 = arith.subf %278, %280 : vector<2x10xf32>
    %cst_103 = arith.constant 1.000000e+00 : f32
    %282 = vector.broadcast %cst_103 : f32 to vector<2x10xf32>
    %283 = arith.subf %281, %282 : vector<2x10xf32>
    %cst_104 = arith.constant 0.000000e+00 : f32
    %284 = vector.broadcast %cst_104 : f32 to vector<2x10xf32>
    %285 = arith.cmpf ogt, %283, %284 : vector<2x10xf32>
    %286 = arith.extui %285 : vector<2x10xi1> to vector<2x10xi32>
    %287 = arith.sitofp %286 : vector<2x10xi32> to vector<2x10xf32>
    %cst_105 = arith.constant dense<0.000000e+00> : vector<2x10xf32>
    %288 = tpu.matmul %287, %8, %cst_105 {dimension_numbers = #tpu.dot_dimension_numbers<[1], [0], [0], [1], [0, 0, 1, 1], [], []>} : vector<2x10xf32>, vector<10x10xf32>, vector<2x10xf32> -> vector<2x10xf32>
    %289 = vector.broadcast %9 : vector<1x10xf32> to vector<2x10xf32>
    %290 = arith.addf %288, %289 : vector<2x10xf32>
    %cst_106 = arith.constant 1.000000e+00 : f32
    %291 = vector.broadcast %cst_106 : f32 to vector<2x10xf32>
    %292 = arith.subf %239, %291 : vector<2x10xf32>
    %cst_107 = arith.constant 0.000000e+00 : f32
    %293 = vector.broadcast %cst_107 : f32 to vector<2x10xf32>
    %294 = arith.cmpf ogt, %292, %293 : vector<2x10xf32>
    %295 = arith.extui %294 : vector<2x10xi1> to vector<2x10xi32>
    %296 = arith.sitofp %295 : vector<2x10xi32> to vector<2x10xf32>
    %cst_108 = arith.constant 1.000000e-01 : f32
    %297 = vector.broadcast %cst_108 : f32 to vector<2x10xf32>
    %298 = arith.mulf %297, %239 : vector<2x10xf32>
    %299 = arith.addf %298, %290 : vector<2x10xf32>
    %cst_109 = arith.constant 1.000000e+00 : f32
    %300 = vector.broadcast %cst_109 : f32 to vector<2x10xf32>
    %301 = arith.mulf %296, %300 : vector<2x10xf32>
    %302 = arith.subf %299, %301 : vector<2x10xf32>
    %cst_110 = arith.constant 1.000000e+00 : f32
    %303 = vector.broadcast %cst_110 : f32 to vector<2x10xf32>
    %304 = arith.subf %302, %303 : vector<2x10xf32>
    %cst_111 = arith.constant 0.000000e+00 : f32
    %305 = vector.broadcast %cst_111 : f32 to vector<2x10xf32>
    %306 = arith.cmpf ogt, %304, %305 : vector<2x10xf32>
    %307 = arith.extui %306 : vector<2x10xi1> to vector<2x10xi32>
    %308 = arith.sitofp %307 : vector<2x10xi32> to vector<2x10xf32>
    %cst_112 = arith.constant dense<0.000000e+00> : vector<2x10xf32>
    %309 = tpu.matmul %308, %10, %cst_112 {dimension_numbers = #tpu.dot_dimension_numbers<[1], [0], [0], [1], [0, 0, 1, 1], [], []>} : vector<2x10xf32>, vector<10x10xf32>, vector<2x10xf32> -> vector<2x10xf32>
    %310 = vector.broadcast %11 : vector<1x10xf32> to vector<2x10xf32>
    %311 = arith.addf %309, %310 : vector<2x10xf32>
    %cst_113 = arith.constant 1.000000e+00 : f32
    %312 = vector.broadcast %cst_113 : f32 to vector<2x10xf32>
    %313 = arith.subf %260, %312 : vector<2x10xf32>
    %cst_114 = arith.constant 0.000000e+00 : f32
    %314 = vector.broadcast %cst_114 : f32 to vector<2x10xf32>
    %315 = arith.cmpf ogt, %313, %314 : vector<2x10xf32>
    %316 = arith.extui %315 : vector<2x10xi1> to vector<2x10xi32>
    %317 = arith.sitofp %316 : vector<2x10xi32> to vector<2x10xf32>
    %cst_115 = arith.constant 1.000000e-01 : f32
    %318 = vector.broadcast %cst_115 : f32 to vector<2x10xf32>
    %319 = arith.mulf %318, %260 : vector<2x10xf32>
    %320 = arith.addf %319, %311 : vector<2x10xf32>
    %cst_116 = arith.constant 1.000000e+00 : f32
    %321 = vector.broadcast %cst_116 : f32 to vector<2x10xf32>
    %322 = arith.mulf %317, %321 : vector<2x10xf32>
    %323 = arith.subf %320, %322 : vector<2x10xf32>
    %cst_117 = arith.constant 1.000000e+00 : f32
    %324 = vector.broadcast %cst_117 : f32 to vector<2x10xf32>
    %325 = arith.subf %323, %324 : vector<2x10xf32>
    %cst_118 = arith.constant 0.000000e+00 : f32
    %326 = vector.broadcast %cst_118 : f32 to vector<2x10xf32>
    %327 = arith.cmpf ogt, %325, %326 : vector<2x10xf32>
    %328 = arith.extui %327 : vector<2x10xi1> to vector<2x10xi32>
    %329 = arith.sitofp %328 : vector<2x10xi32> to vector<2x10xf32>
    %330 = arith.addf %267, %329 : vector<2x10xf32>
    %cst_119 = arith.constant 1.000000e+00 : f32
    %331 = vector.broadcast %cst_119 : f32 to vector<2x10xf32>
    %332 = arith.subf %281, %331 : vector<2x10xf32>
    %cst_120 = arith.constant 0.000000e+00 : f32
    %333 = vector.broadcast %cst_120 : f32 to vector<2x10xf32>
    %334 = arith.cmpf ogt, %332, %333 : vector<2x10xf32>
    %335 = arith.extui %334 : vector<2x10xi1> to vector<2x10xi32>
    %336 = arith.sitofp %335 : vector<2x10xi32> to vector<2x10xf32>
    %cst_121 = arith.constant 1.000000e-01 : f32
    %337 = vector.broadcast %cst_121 : f32 to vector<2x10xf32>
    %338 = arith.mulf %337, %281 : vector<2x10xf32>
    %339 = vector.extract_strided_slice %7 {offsets = [0, 5, 0], sizes = [2, 1, 10], strides = [1, 1, 1]} : vector<2x8x10xf32> to vector<2x1x10xf32>
    %340 = vector.shape_cast %339 : vector<2x1x10xf32> to vector<2x10xf32>
    %341 = arith.addf %338, %340 : vector<2x10xf32>
    %cst_122 = arith.constant 1.000000e+00 : f32
    %342 = vector.broadcast %cst_122 : f32 to vector<2x10xf32>
    %343 = arith.mulf %336, %342 : vector<2x10xf32>
    %344 = arith.subf %341, %343 : vector<2x10xf32>
    %cst_123 = arith.constant 1.000000e+00 : f32
    %345 = vector.broadcast %cst_123 : f32 to vector<2x10xf32>
    %346 = arith.subf %344, %345 : vector<2x10xf32>
    %cst_124 = arith.constant 0.000000e+00 : f32
    %347 = vector.broadcast %cst_124 : f32 to vector<2x10xf32>
    %348 = arith.cmpf ogt, %346, %347 : vector<2x10xf32>
    %349 = arith.extui %348 : vector<2x10xi1> to vector<2x10xi32>
    %350 = arith.sitofp %349 : vector<2x10xi32> to vector<2x10xf32>
    %cst_125 = arith.constant dense<0.000000e+00> : vector<2x10xf32>
    %351 = tpu.matmul %350, %8, %cst_125 {dimension_numbers = #tpu.dot_dimension_numbers<[1], [0], [0], [1], [0, 0, 1, 1], [], []>} : vector<2x10xf32>, vector<10x10xf32>, vector<2x10xf32> -> vector<2x10xf32>
    %352 = vector.broadcast %9 : vector<1x10xf32> to vector<2x10xf32>
    %353 = arith.addf %351, %352 : vector<2x10xf32>
    %cst_126 = arith.constant 1.000000e+00 : f32
    %354 = vector.broadcast %cst_126 : f32 to vector<2x10xf32>
    %355 = arith.subf %302, %354 : vector<2x10xf32>
    %cst_127 = arith.constant 0.000000e+00 : f32
    %356 = vector.broadcast %cst_127 : f32 to vector<2x10xf32>
    %357 = arith.cmpf ogt, %355, %356 : vector<2x10xf32>
    %358 = arith.extui %357 : vector<2x10xi1> to vector<2x10xi32>
    %359 = arith.sitofp %358 : vector<2x10xi32> to vector<2x10xf32>
    %cst_128 = arith.constant 1.000000e-01 : f32
    %360 = vector.broadcast %cst_128 : f32 to vector<2x10xf32>
    %361 = arith.mulf %360, %302 : vector<2x10xf32>
    %362 = arith.addf %361, %353 : vector<2x10xf32>
    %cst_129 = arith.constant 1.000000e+00 : f32
    %363 = vector.broadcast %cst_129 : f32 to vector<2x10xf32>
    %364 = arith.mulf %359, %363 : vector<2x10xf32>
    %365 = arith.subf %362, %364 : vector<2x10xf32>
    %cst_130 = arith.constant 1.000000e+00 : f32
    %366 = vector.broadcast %cst_130 : f32 to vector<2x10xf32>
    %367 = arith.subf %365, %366 : vector<2x10xf32>
    %cst_131 = arith.constant 0.000000e+00 : f32
    %368 = vector.broadcast %cst_131 : f32 to vector<2x10xf32>
    %369 = arith.cmpf ogt, %367, %368 : vector<2x10xf32>
    %370 = arith.extui %369 : vector<2x10xi1> to vector<2x10xi32>
    %371 = arith.sitofp %370 : vector<2x10xi32> to vector<2x10xf32>
    %cst_132 = arith.constant dense<0.000000e+00> : vector<2x10xf32>
    %372 = tpu.matmul %371, %10, %cst_132 {dimension_numbers = #tpu.dot_dimension_numbers<[1], [0], [0], [1], [0, 0, 1, 1], [], []>} : vector<2x10xf32>, vector<10x10xf32>, vector<2x10xf32> -> vector<2x10xf32>
    %373 = vector.broadcast %11 : vector<1x10xf32> to vector<2x10xf32>
    %374 = arith.addf %372, %373 : vector<2x10xf32>
    %cst_133 = arith.constant 1.000000e+00 : f32
    %375 = vector.broadcast %cst_133 : f32 to vector<2x10xf32>
    %376 = arith.subf %323, %375 : vector<2x10xf32>
    %cst_134 = arith.constant 0.000000e+00 : f32
    %377 = vector.broadcast %cst_134 : f32 to vector<2x10xf32>
    %378 = arith.cmpf ogt, %376, %377 : vector<2x10xf32>
    %379 = arith.extui %378 : vector<2x10xi1> to vector<2x10xi32>
    %380 = arith.sitofp %379 : vector<2x10xi32> to vector<2x10xf32>
    %cst_135 = arith.constant 1.000000e-01 : f32
    %381 = vector.broadcast %cst_135 : f32 to vector<2x10xf32>
    %382 = arith.mulf %381, %323 : vector<2x10xf32>
    %383 = arith.addf %382, %374 : vector<2x10xf32>
    %cst_136 = arith.constant 1.000000e+00 : f32
    %384 = vector.broadcast %cst_136 : f32 to vector<2x10xf32>
    %385 = arith.mulf %380, %384 : vector<2x10xf32>
    %386 = arith.subf %383, %385 : vector<2x10xf32>
    %cst_137 = arith.constant 1.000000e+00 : f32
    %387 = vector.broadcast %cst_137 : f32 to vector<2x10xf32>
    %388 = arith.subf %386, %387 : vector<2x10xf32>
    %cst_138 = arith.constant 0.000000e+00 : f32
    %389 = vector.broadcast %cst_138 : f32 to vector<2x10xf32>
    %390 = arith.cmpf ogt, %388, %389 : vector<2x10xf32>
    %391 = arith.extui %390 : vector<2x10xi1> to vector<2x10xi32>
    %392 = arith.sitofp %391 : vector<2x10xi32> to vector<2x10xf32>
    %393 = arith.addf %330, %392 : vector<2x10xf32>
    %cst_139 = arith.constant 1.000000e+00 : f32
    %394 = vector.broadcast %cst_139 : f32 to vector<2x10xf32>
    %395 = arith.subf %344, %394 : vector<2x10xf32>
    %cst_140 = arith.constant 0.000000e+00 : f32
    %396 = vector.broadcast %cst_140 : f32 to vector<2x10xf32>
    %397 = arith.cmpf ogt, %395, %396 : vector<2x10xf32>
    %398 = arith.extui %397 : vector<2x10xi1> to vector<2x10xi32>
    %399 = arith.sitofp %398 : vector<2x10xi32> to vector<2x10xf32>
    %cst_141 = arith.constant 1.000000e-01 : f32
    %400 = vector.broadcast %cst_141 : f32 to vector<2x10xf32>
    %401 = arith.mulf %400, %344 : vector<2x10xf32>
    %402 = vector.extract_strided_slice %7 {offsets = [0, 6, 0], sizes = [2, 1, 10], strides = [1, 1, 1]} : vector<2x8x10xf32> to vector<2x1x10xf32>
    %403 = vector.shape_cast %402 : vector<2x1x10xf32> to vector<2x10xf32>
    %404 = arith.addf %401, %403 : vector<2x10xf32>
    %cst_142 = arith.constant 1.000000e+00 : f32
    %405 = vector.broadcast %cst_142 : f32 to vector<2x10xf32>
    %406 = arith.mulf %399, %405 : vector<2x10xf32>
    %407 = arith.subf %404, %406 : vector<2x10xf32>
    %cst_143 = arith.constant 1.000000e+00 : f32
    %408 = vector.broadcast %cst_143 : f32 to vector<2x10xf32>
    %409 = arith.subf %407, %408 : vector<2x10xf32>
    %cst_144 = arith.constant 0.000000e+00 : f32
    %410 = vector.broadcast %cst_144 : f32 to vector<2x10xf32>
    %411 = arith.cmpf ogt, %409, %410 : vector<2x10xf32>
    %412 = arith.extui %411 : vector<2x10xi1> to vector<2x10xi32>
    %413 = arith.sitofp %412 : vector<2x10xi32> to vector<2x10xf32>
    %cst_145 = arith.constant dense<0.000000e+00> : vector<2x10xf32>
    %414 = tpu.matmul %413, %8, %cst_145 {dimension_numbers = #tpu.dot_dimension_numbers<[1], [0], [0], [1], [0, 0, 1, 1], [], []>} : vector<2x10xf32>, vector<10x10xf32>, vector<2x10xf32> -> vector<2x10xf32>
    %415 = vector.broadcast %9 : vector<1x10xf32> to vector<2x10xf32>
    %416 = arith.addf %414, %415 : vector<2x10xf32>
    %cst_146 = arith.constant 1.000000e+00 : f32
    %417 = vector.broadcast %cst_146 : f32 to vector<2x10xf32>
    %418 = arith.subf %365, %417 : vector<2x10xf32>
    %cst_147 = arith.constant 0.000000e+00 : f32
    %419 = vector.broadcast %cst_147 : f32 to vector<2x10xf32>
    %420 = arith.cmpf ogt, %418, %419 : vector<2x10xf32>
    %421 = arith.extui %420 : vector<2x10xi1> to vector<2x10xi32>
    %422 = arith.sitofp %421 : vector<2x10xi32> to vector<2x10xf32>
    %cst_148 = arith.constant 1.000000e-01 : f32
    %423 = vector.broadcast %cst_148 : f32 to vector<2x10xf32>
    %424 = arith.mulf %423, %365 : vector<2x10xf32>
    %425 = arith.addf %424, %416 : vector<2x10xf32>
    %cst_149 = arith.constant 1.000000e+00 : f32
    %426 = vector.broadcast %cst_149 : f32 to vector<2x10xf32>
    %427 = arith.mulf %422, %426 : vector<2x10xf32>
    %428 = arith.subf %425, %427 : vector<2x10xf32>
    %cst_150 = arith.constant 1.000000e+00 : f32
    %429 = vector.broadcast %cst_150 : f32 to vector<2x10xf32>
    %430 = arith.subf %428, %429 : vector<2x10xf32>
    %cst_151 = arith.constant 0.000000e+00 : f32
    %431 = vector.broadcast %cst_151 : f32 to vector<2x10xf32>
    %432 = arith.cmpf ogt, %430, %431 : vector<2x10xf32>
    %433 = arith.extui %432 : vector<2x10xi1> to vector<2x10xi32>
    %434 = arith.sitofp %433 : vector<2x10xi32> to vector<2x10xf32>
    %cst_152 = arith.constant dense<0.000000e+00> : vector<2x10xf32>
    %435 = tpu.matmul %434, %10, %cst_152 {dimension_numbers = #tpu.dot_dimension_numbers<[1], [0], [0], [1], [0, 0, 1, 1], [], []>} : vector<2x10xf32>, vector<10x10xf32>, vector<2x10xf32> -> vector<2x10xf32>
    %436 = vector.broadcast %11 : vector<1x10xf32> to vector<2x10xf32>
    %437 = arith.addf %435, %436 : vector<2x10xf32>
    %cst_153 = arith.constant 1.000000e+00 : f32
    %438 = vector.broadcast %cst_153 : f32 to vector<2x10xf32>
    %439 = arith.subf %386, %438 : vector<2x10xf32>
    %cst_154 = arith.constant 0.000000e+00 : f32
    %440 = vector.broadcast %cst_154 : f32 to vector<2x10xf32>
    %441 = arith.cmpf ogt, %439, %440 : vector<2x10xf32>
    %442 = arith.extui %441 : vector<2x10xi1> to vector<2x10xi32>
    %443 = arith.sitofp %442 : vector<2x10xi32> to vector<2x10xf32>
    %cst_155 = arith.constant 1.000000e-01 : f32
    %444 = vector.broadcast %cst_155 : f32 to vector<2x10xf32>
    %445 = arith.mulf %444, %386 : vector<2x10xf32>
    %446 = arith.addf %445, %437 : vector<2x10xf32>
    %cst_156 = arith.constant 1.000000e+00 : f32
    %447 = vector.broadcast %cst_156 : f32 to vector<2x10xf32>
    %448 = arith.mulf %443, %447 : vector<2x10xf32>
    %449 = arith.subf %446, %448 : vector<2x10xf32>
    %cst_157 = arith.constant 1.000000e+00 : f32
    %450 = vector.broadcast %cst_157 : f32 to vector<2x10xf32>
    %451 = arith.subf %449, %450 : vector<2x10xf32>
    %cst_158 = arith.constant 0.000000e+00 : f32
    %452 = vector.broadcast %cst_158 : f32 to vector<2x10xf32>
    %453 = arith.cmpf ogt, %451, %452 : vector<2x10xf32>
    %454 = arith.extui %453 : vector<2x10xi1> to vector<2x10xi32>
    %455 = arith.sitofp %454 : vector<2x10xi32> to vector<2x10xf32>
    %456 = arith.addf %393, %455 : vector<2x10xf32>
    %cst_159 = arith.constant 1.000000e+00 : f32
    %457 = vector.broadcast %cst_159 : f32 to vector<2x10xf32>
    %458 = arith.subf %407, %457 : vector<2x10xf32>
    %cst_160 = arith.constant 0.000000e+00 : f32
    %459 = vector.broadcast %cst_160 : f32 to vector<2x10xf32>
    %460 = arith.cmpf ogt, %458, %459 : vector<2x10xf32>
    %461 = arith.extui %460 : vector<2x10xi1> to vector<2x10xi32>
    %462 = arith.sitofp %461 : vector<2x10xi32> to vector<2x10xf32>
    %cst_161 = arith.constant 1.000000e-01 : f32
    %463 = vector.broadcast %cst_161 : f32 to vector<2x10xf32>
    %464 = arith.mulf %463, %407 : vector<2x10xf32>
    %465 = vector.extract_strided_slice %7 {offsets = [0, 7, 0], sizes = [2, 1, 10], strides = [1, 1, 1]} : vector<2x8x10xf32> to vector<2x1x10xf32>
    %466 = vector.shape_cast %465 : vector<2x1x10xf32> to vector<2x10xf32>
    %467 = arith.addf %464, %466 : vector<2x10xf32>
    %cst_162 = arith.constant 1.000000e+00 : f32
    %468 = vector.broadcast %cst_162 : f32 to vector<2x10xf32>
    %469 = arith.mulf %462, %468 : vector<2x10xf32>
    %470 = arith.subf %467, %469 : vector<2x10xf32>
    %cst_163 = arith.constant 1.000000e+00 : f32
    %471 = vector.broadcast %cst_163 : f32 to vector<2x10xf32>
    %472 = arith.subf %470, %471 : vector<2x10xf32>
    %cst_164 = arith.constant 0.000000e+00 : f32
    %473 = vector.broadcast %cst_164 : f32 to vector<2x10xf32>
    %474 = arith.cmpf ogt, %472, %473 : vector<2x10xf32>
    %475 = arith.extui %474 : vector<2x10xi1> to vector<2x10xi32>
    %476 = arith.sitofp %475 : vector<2x10xi32> to vector<2x10xf32>
    %cst_165 = arith.constant dense<0.000000e+00> : vector<2x10xf32>
    %477 = tpu.matmul %476, %8, %cst_165 {dimension_numbers = #tpu.dot_dimension_numbers<[1], [0], [0], [1], [0, 0, 1, 1], [], []>} : vector<2x10xf32>, vector<10x10xf32>, vector<2x10xf32> -> vector<2x10xf32>
    %478 = vector.broadcast %9 : vector<1x10xf32> to vector<2x10xf32>
    %479 = arith.addf %477, %478 : vector<2x10xf32>
    %cst_166 = arith.constant 1.000000e+00 : f32
    %480 = vector.broadcast %cst_166 : f32 to vector<2x10xf32>
    %481 = arith.subf %428, %480 : vector<2x10xf32>
    %cst_167 = arith.constant 0.000000e+00 : f32
    %482 = vector.broadcast %cst_167 : f32 to vector<2x10xf32>
    %483 = arith.cmpf ogt, %481, %482 : vector<2x10xf32>
    %484 = arith.extui %483 : vector<2x10xi1> to vector<2x10xi32>
    %485 = arith.sitofp %484 : vector<2x10xi32> to vector<2x10xf32>
    %cst_168 = arith.constant 1.000000e-01 : f32
    %486 = vector.broadcast %cst_168 : f32 to vector<2x10xf32>
    %487 = arith.mulf %486, %428 : vector<2x10xf32>
    %488 = arith.addf %487, %479 : vector<2x10xf32>
    %cst_169 = arith.constant 1.000000e+00 : f32
    %489 = vector.broadcast %cst_169 : f32 to vector<2x10xf32>
    %490 = arith.mulf %485, %489 : vector<2x10xf32>
    %491 = arith.subf %488, %490 : vector<2x10xf32>
    %cst_170 = arith.constant 1.000000e+00 : f32
    %492 = vector.broadcast %cst_170 : f32 to vector<2x10xf32>
    %493 = arith.subf %491, %492 : vector<2x10xf32>
    %cst_171 = arith.constant 0.000000e+00 : f32
    %494 = vector.broadcast %cst_171 : f32 to vector<2x10xf32>
    %495 = arith.cmpf ogt, %493, %494 : vector<2x10xf32>
    %496 = arith.extui %495 : vector<2x10xi1> to vector<2x10xi32>
    %497 = arith.sitofp %496 : vector<2x10xi32> to vector<2x10xf32>
    %cst_172 = arith.constant dense<0.000000e+00> : vector<2x10xf32>
    %498 = tpu.matmul %497, %10, %cst_172 {dimension_numbers = #tpu.dot_dimension_numbers<[1], [0], [0], [1], [0, 0, 1, 1], [], []>} : vector<2x10xf32>, vector<10x10xf32>, vector<2x10xf32> -> vector<2x10xf32>
    %499 = vector.broadcast %11 : vector<1x10xf32> to vector<2x10xf32>
    %500 = arith.addf %498, %499 : vector<2x10xf32>
    %cst_173 = arith.constant 1.000000e+00 : f32
    %501 = vector.broadcast %cst_173 : f32 to vector<2x10xf32>
    %502 = arith.subf %449, %501 : vector<2x10xf32>
    %cst_174 = arith.constant 0.000000e+00 : f32
    %503 = vector.broadcast %cst_174 : f32 to vector<2x10xf32>
    %504 = arith.cmpf ogt, %502, %503 : vector<2x10xf32>
    %505 = arith.extui %504 : vector<2x10xi1> to vector<2x10xi32>
    %506 = arith.sitofp %505 : vector<2x10xi32> to vector<2x10xf32>
    %cst_175 = arith.constant 1.000000e-01 : f32
    %507 = vector.broadcast %cst_175 : f32 to vector<2x10xf32>
    %508 = arith.mulf %507, %449 : vector<2x10xf32>
    %509 = arith.addf %508, %500 : vector<2x10xf32>
    %cst_176 = arith.constant 1.000000e+00 : f32
    %510 = vector.broadcast %cst_176 : f32 to vector<2x10xf32>
    %511 = arith.mulf %506, %510 : vector<2x10xf32>
    %512 = arith.subf %509, %511 : vector<2x10xf32>
    %cst_177 = arith.constant 1.000000e+00 : f32
    %513 = vector.broadcast %cst_177 : f32 to vector<2x10xf32>
    %514 = arith.subf %512, %513 : vector<2x10xf32>
    %cst_178 = arith.constant 0.000000e+00 : f32
    %515 = vector.broadcast %cst_178 : f32 to vector<2x10xf32>
    %516 = arith.cmpf ogt, %514, %515 : vector<2x10xf32>
    %517 = arith.extui %516 : vector<2x10xi1> to vector<2x10xi32>
    %518 = arith.sitofp %517 : vector<2x10xi32> to vector<2x10xf32>
    %519 = arith.addf %456, %518 : vector<2x10xf32>
    %cst_179 = arith.constant dense<0xFF800000> : vector<2xf32>
    %520 = vector.multi_reduction <maximumf>, %519, %cst_179 [1] : vector<2x10xf32> to vector<2xf32>
    %521 = vector.shape_cast %520 : vector<2xf32> to vector<2x1xf32>
    %522 = vector.broadcast %521 : vector<2x1xf32> to vector<2x10xf32>
    %523 = arith.subf %519, %522 : vector<2x10xf32>
    %524 = math.exp %523 : vector<2x10xf32>
    %cst_180 = arith.constant dense<0.000000e+00> : vector<2xf32>
    %525 = vector.multi_reduction <add>, %524, %cst_180 [1] : vector<2x10xf32> to vector<2xf32>
    %526 = vector.shape_cast %525 : vector<2xf32> to vector<2x1xf32>
    %527 = tpu.reciprocal %526 {approx = true} : vector<2x1xf32> -> vector<2x1xf32>
    %528 = vector.broadcast %527 : vector<2x1xf32> to vector<2x10xf32>
    %529 = arith.mulf %524, %528 : vector<2x10xf32>
    %c0_181 = arith.constant 0 : index
    %c0_182 = arith.constant 0 : index
    %530 = vector.load %arg7[%c0_181, %c0_182] : memref<2x10xf32, #tpu.memory_space<vmem>>, vector<2x10xf32>
    tpu.vector_store %arg7[%c0_181, %c0_182], %529 {strides = array<i32>} : memref<2x10xf32, #tpu.memory_space<vmem>>, vector<2x10xf32>,
    return
  }
}

</mosaic_0001>

<bundles_post_ra>
// kernel: leaky_three_layer_forward.1
= control target key start
LH: loop header
LB: loop body
LE: loop exit
PB: predicated region body
PF: predicated region fallthrough
CT: control target
= control target key end

     0   :  { %s2209_s0 = inlined_call_operand.vmem [shape: f32[2,8,784], index: 0, kind: input, shape index: {}]   ;;  %s2210_s1 = inlined_call_operand.vmem [shape: f32[784,10], index: 1, kind: input, shape index: {}]   ;;  %s2211_s2 = inlined_call_operand.vmem [shape: f32[1,1,10], index: 2, kind: input, shape index: {}]   ;;  %s2212_s3 = inlined_call_operand.vmem [shape: f32[10,10], index: 3, kind: input, shape index: {}]   ;;  %s2213_s4 = inlined_call_operand.vmem [shape: f32[1,10], index: 4, kind: input, shape index: {}]   ;;  %s2214_s5 = inlined_call_operand.vmem [shape: f32[10,10], index: 5, kind: input, shape index: {}]   ;;  %s2215_s6 = inlined_call_operand.vmem [shape: f32[1,10], index: 6, kind: input, shape index: {}]   ;;  %s2216_s7 = inlined_call_operand.hbm [shape: f32[2,10], index: 7, kind: output, shape index: {}]  }
   0x1   :  { %v1311_v0 = vld [vmem:[%s2210_s1 + $0x78] sm:$0xff]  ;;  %v1328_v3 = vld [vmem:[%s2210_s1 + $0x70] sm:$0xff]  ;;  %v1350_v7 = vld [vmem:[%s2210_s1 + $0x68] sm:$0xff] }
   0x2   :  { %v1316_v1 = vld [vmem:[%s2210_s1 + $0x178] sm:$0xff]  ;;  %147 = vmatpush.msra.mxu0 %v1311_v0  ;;  %v1338_v5 = vld [vmem:[%s2210_s1 + $0x170] sm:$0xff]  ;;  %v1362_v9 = vld [vmem:[%s2210_s1 + $0x168] sm:$0xff] }
   0x3   :  { %v1321_v2 = vld [vmem:[%s2210_s1 + $0x1f8] sm:$0xff]  ;;  %187 = vmatpush.msra.mxu2 %v1316_v1  ;;  %v1345_v6 = vld [vmem:[%s2210_s1 + $0x1f0] sm:$0xff]  ;;  %v1367_v10 = vld [vmem:[%s2210_s1 + $0x1e8] sm:$0xff] }
   0x4   :  { %v1333_v4 = vld [vmem:[%s2210_s1 + $0xf8] sm:$0xff]  ;;  %207 = vmatpush.msra.mxu3 %v1321_v2  ;;  %v1355_v8 = vld [vmem:[%s2210_s1 + $0xf0] sm:$0xff]  ;;  %148 = vmatpush.msra.mxu0 %v1328_v3  ;;  %v1374_v11 = vld [vmem:[%s2210_s1 + $0x60] sm:$0xff] }
   0x5   :  { %167 = vmatpush.msra.mxu1 %v1333_v4  ;;  %188 = vmatpush.msra.mxu2 %v1338_v5  ;;  %v1379_v12 = vld [vmem:[%s2210_s1 + $0xe8] sm:$0xff]  ;;  %v1384_v13 = vld [vmem:[%s2210_s1 + $0x160] sm:$0xff]  ;;  %v1403_v16 = vld [vmem:[%s2210_s1 + $0x58] sm:$0xff] }
   0x6   :  { %208 = vmatpush.msra.mxu3 %v1345_v6  ;;  %149 = vmatpush.msra.mxu0 %v1350_v7  ;;  %v1391_v14 = vld [vmem:[%s2210_s1 + $0x1e0] sm:$0xff]  ;;  %v1408_v17 = vld [vmem:[%s2210_s1 + $0x158] sm:$0xff]  ;;  %v1427_v20 = vld [vmem:[%s2210_s1 + $0x50] sm:$0xff] }
   0x7   :  { %168 = vmatpush.msra.mxu1 %v1355_v8  ;;  %189 = vmatpush.msra.mxu2 %v1362_v9  ;;  %v1396_v15 = vld [vmem:[%s2210_s1 + $0xe0] sm:$0xff]  ;;  %v1415_v18 = vld [vmem:[%s2210_s1 + $0x1d8] sm:$0xff]  ;;  %v1432_v21 = vld [vmem:[%s2210_s1 + $0x150] sm:$0xff] }
   0x8   :  { %209 = vmatpush.msra.mxu3 %v1367_v10  ;;  %150 = vmatpush.msra.mxu0 %v1374_v11  ;;  %v1420_v19 = vld [vmem:[%s2210_s1 + $0xd8] sm:$0xff]  ;;  %v1439_v22 = vld [vmem:[%s2210_s1 + $0x1d0] sm:$0xff]  ;;  %v1451_v24 = vld [vmem:[%s2210_s1 + $0x48] sm:$0xff] }
   0x9   :  { %169 = vmatpush.msra.mxu1 %v1379_v12  ;;  %190 = vmatpush.msra.mxu2 %v1384_v13  ;;  %v1444_v23 = vld [vmem:[%s2210_s1 + $0xd0] sm:$0xff]  ;;  %v1456_v25 = vld [vmem:[%s2210_s1 + $0x148] sm:$0xff]  ;;  %v1475_v28 = vld [vmem:[%s2210_s1 + $0x40] sm:$0xff] }
   0xa   :  { %210 = vmatpush.msra.mxu3 %v1391_v14  ;;  %151 = vmatpush.msra.mxu0 %v1403_v16  ;;  %v1463_v26 = vld [vmem:[%s2210_s1 + $0x1c8] sm:$0xff]  ;;  %v1480_v29 = vld [vmem:[%s2210_s1 + $0x140] sm:$0xff]  ;;  %v1499_v32 = vld [vmem:[%s2210_s1 + $0x38] sm:$0xff] }
   0xb   :  { %170 = vmatpush.msra.mxu1 %v1396_v15  ;;  %191 = vmatpush.msra.mxu2 %v1408_v17  ;;  %v1468_v27 = vld [vmem:[%s2210_s1 + $0xc8] sm:$0xff]  ;;  %v1487_v30 = vld [vmem:[%s2210_s1 + $0x1c0] sm:$0xff]  ;;  %v1504_v33 = vld [vmem:[%s2210_s1 + $0x138] sm:$0xff] }
   0xc   :  { %211 = vmatpush.msra.mxu3 %v1415_v18  ;;  %152 = vmatpush.msra.mxu0 %v1427_v20  ;;  %v1492_v31 = vld [vmem:[%s2210_s1 + $0xc0] sm:$0xff]  ;;  %v1511_v34 = vld [vmem:[%s2210_s1 + $0x1b8] sm:$0xff]  ;;  %v1523_v36 = vld [vmem:[%s2210_s1 + $0x30] sm:$0xff] }
   0xd   :  { %171 = vmatpush.msra.mxu1 %v1420_v19  ;;  %192 = vmatpush.msra.mxu2 %v1432_v21  ;;  %v1516_v35 = vld [vmem:[%s2210_s1 + $0xb8] sm:$0xff]  ;;  %v1528_v37 = vld [vmem:[%s2210_s1 + $0x130] sm:$0xff]  ;;  %v1547_v40 = vld [vmem:[%s2210_s1 + $0x28] sm:$0xff] }
   0xe   :  { %212 = vmatpush.msra.mxu3 %v1439_v22  ;;  %153 = vmatpush.msra.mxu0 %v1451_v24  ;;  %v1535_v38 = vld [vmem:[%s2210_s1 + $0x1b0] sm:$0xff]  ;;  %v1552_v41 = vld [vmem:[%s2210_s1 + $0x128] sm:$0xff]  ;;  %v1571_v44 = vld [vmem:[%s2210_s1 + $0x20] sm:$0xff] }
   0xf   :  { %172 = vmatpush.msra.mxu1 %v1444_v23  ;;  %193 = vmatpush.msra.mxu2 %v1456_v25  ;;  %v1540_v39 = vld [vmem:[%s2210_s1 + $0xb0] sm:$0xff]  ;;  %v1559_v42 = vld [vmem:[%s2210_s1 + $0x1a8] sm:$0xff]  ;;  %v1576_v45 = vld [vmem:[%s2210_s1 + $0x120] sm:$0xff] }
  0x10   :  { %213 = vmatpush.msra.mxu3 %v1463_v26  ;;  %154 = vmatpush.msra.mxu0 %v1475_v28  ;;  %v1564_v43 = vld [vmem:[%s2210_s1 + $0xa8] sm:$0xff]  ;;  %v1583_v46 = vld [vmem:[%s2210_s1 + $0x1a0] sm:$0xff]  ;;  %v1595_v48 = vld [vmem:[%s2210_s1 + $0x18] sm:$0xff] }
  0x11   :  { %173 = vmatpush.msra.mxu1 %v1468_v27  ;;  %194 = vmatpush.msra.mxu2 %v1480_v29  ;;  %2227 = vst [vmem:[#allocation5_spill] sm:$0xff] %v1583_v46  ;;  %v1588_v47 = vld [vmem:[%s2210_s1 + $0xa0] sm:$0xff]  ;;  %v1600_v49 = vld [vmem:[%s2210_s1 + $0x118] sm:$0xff]  ;;  %v1619_v52 = vld [vmem:[%s2210_s1 + $0x10] sm:$0xff] }
  0x12   :  { %214 = vmatpush.msra.mxu3 %v1487_v30  ;;  %155 = vmatpush.msra.mxu0 %v1499_v32  ;;  %v1607_v50 = vld [vmem:[%s2210_s1 + $0x198] sm:$0xff]  ;;  %v1624_v53 = vld [vmem:[%s2210_s1 + $0x110] sm:$0xff]  ;;  %v1643_v56 = vld [vmem:[%s2210_s1 + $0x8] sm:$0xff] }
  0x13   :  { %174 = vmatpush.msra.mxu1 %v1492_v31  ;;  %195 = vmatpush.msra.mxu2 %v1504_v33  ;;  %2228 = vst [vmem:[#allocation6_spill] sm:$0xff] %v1607_v50  ;;  %v1612_v51 = vld [vmem:[%s2210_s1 + $0x98] sm:$0xff]  ;;  %v1631_v54 = vld [vmem:[%s2210_s1 + $0x190] sm:$0xff]  ;;  %v1648_v57 = vld [vmem:[%s2210_s1 + $0x108] sm:$0xff] }
  0x14   :  { %215 = vmatpush.msra.mxu3 %v1511_v34  ;;  %156 = vmatpush.msra.mxu0 %v1523_v36  ;;  %2229 = vst [vmem:[#allocation7_spill] sm:$0xff] %v1624_v53  ;;  %v1636_v55 = vld [vmem:[%s2210_s1 + $0x90] sm:$0xff]  ;;  %v1655_v58 = vld [vmem:[%s2210_s1 + $0x188] sm:$0xff]  ;;  %v1667_v60 = vld [vmem:[%s2210_s1] sm:$0xff] }
  0x15   :  { %175 = vmatpush.msra.mxu1 %v1516_v35  ;;  %196 = vmatpush.msra.mxu2 %v1528_v37  ;;  %2230 = vst [vmem:[#allocation8_spill] sm:$0xff] %v1631_v54  ;;  %v1660_v59 = vld [vmem:[%s2210_s1 + $0x88] sm:$0xff]  ;;  %v1672_v61 = vld [vmem:[%s2210_s1 + $0x100] sm:$0xff]  ;;  %v1684_v63 = vld [vmem:[%s2210_s1 + $0x278] sm:$0xff] }
  0x16   :  { %216 = vmatpush.msra.mxu3 %v1535_v38  ;;  %157 = vmatpush.msra.mxu0 %v1547_v40  ;;  %2231 = vst [vmem:[#allocation9_spill] sm:$0xff] %v1648_v57  ;;  %v1679_v62 = vld [vmem:[%s2210_s1 + $0x180] sm:$0xff] }
  0x17   :  { %176 = vmatpush.msra.mxu1 %v1540_v39  ;;  %197 = vmatpush.msra.mxu2 %v1552_v41  ;;  %2232 = vst [vmem:[#allocation10_spill] sm:$0xff] %v1655_v58 }
  0x18   :  { %217 = vmatpush.msra.mxu3 %v1559_v42  ;;  %158 = vmatpush.msra.mxu0 %v1571_v44  ;;  %2233 = vst [vmem:[#allocation11_spill] sm:$0xff] %v1672_v61 }
  0x19   :  { %177 = vmatpush.msra.mxu1 %v1564_v43  ;;  %198 = vmatpush.msra.mxu2 %v1576_v45  ;;  %2234 = vst [vmem:[#allocation12_spill] sm:$0xff] %v1679_v62 }
  0x1a   :  { %218 = vmatpush.msra.mxu3 %v1583_v46  ;;  %159 = vmatpush.msra.mxu0 %v1595_v48  ;;  %v1732_v46 = vld [vmem:[%s2210_s1 + $0x2f0] sm:$0xff] }
  0x1b   :  { %178 = vmatpush.msra.mxu1 %v1588_v47  ;;  %199 = vmatpush.msra.mxu2 %v1600_v49 }
  0x1c   :  { %219 = vmatpush.msra.mxu3 %v1607_v50  ;;  %160 = vmatpush.msra.mxu0 %v1619_v52  ;;  %v1710_v50 = vld [vmem:[%s2210_s1 + $0x2f8] sm:$0xff] }
  0x1d   :  { %179 = vmatpush.msra.mxu1 %v1612_v51  ;;  %200 = vmatpush.msra.mxu2 %v1624_v53  ;;  %v1715_v53 = vld [vmem:[%s2210_s1 + $0x300] sm:$0xff] }
  0x1e   :  { %220 = vmatpush.msra.mxu3 %v1631_v54  ;;  %161 = vmatpush.msra.mxu0 %v1643_v56  ;;  %v1691_v54 = vld [vmem:[%s2210_s1 + $0x308] sm:$0xff]  ;;  %2236 = vst [vmem:[#allocation14_spill] sm:$0xff] %v1715_v53 }
  0x1f   :  { %180 = vmatpush.msra.mxu1 %v1636_v55  ;;  %201 = vmatpush.msra.mxu2 %v1648_v57  ;;  %2235 = vst [vmem:[#allocation13_spill] sm:$0xff] %v1691_v54  ;;  %v1696_v57 = vld [vmem:[%s2210_s1 + $0x80] sm:$0xff] }
  0x20   :  { %221 = vmatpush.msra.mxu3 %v1655_v58  ;;  %162 = vmatpush.msra.mxu0 %v1667_v60  ;;  %v1703_v58 = vld [vmem:[%s2210_s1 + $0x270] sm:$0xff] }
  0x21   :  { %181 = vmatpush.msra.mxu1 %v1660_v59  ;;  %202 = vmatpush.msra.mxu2 %v1672_v61  ;;  %v1725_v61 = vld [vmem:[%s2210_s1 + $0x268] sm:$0xff] }
  0x22   :  { %222 = vmatpush.msra.mxu3 %v1679_v62  ;;  %227 = vmatpush.msrb.mxu0 %v1684_v63  ;;  %v127_v62 = vld [vmem:[%s2209_s0 + $0x10] sm:$0xff] }
  0x23   :  { %281 = vmatpush.msrb.mxu2 %v1691_v54  ;;  %182 = vmatpush.msra.mxu1 %v1696_v57  ;;  %v125_v54 = vld [vmem:[%s2209_s0] sm:$0xff] }
  0x24   :  { %290 = vmatpush.msrb.mxu3 %v1311_v0  ;;  %228 = vmatpush.msrb.mxu0 %v1703_v58 }
  0x25   :  { %247 = vmatpush.msrb.mxu1 %v1710_v50  ;;  %282 = vmatpush.msrb.mxu2 %v1715_v53 }
  0x26   :  { %12 = vsyncpa [#allocation3], 0  ;;  %203 = vmatmul.f32.vlgmr.msra.gmra.mxu2 %v127_v62  ;;  %291 = vmatpush.msrb.mxu3 %v1328_v3  ;;  %v128_v0 = vld [vmem:[%s2209_s0 + $0x18] sm:$0xff]  ;;  %v1748_v53 = vld [vmem:[%s2210_s1 + $0x260] sm:$0xff]  ;;  %vm143_vm0 = vcmask 130048   ;;  %vm462_vm2 = vcmask 1041408  }
  0x27   :  { %310 = vmatpush.msra.mxu2 %v1333_v4  ;;  %229 = vmatpush.msrb.mxu0 %v1725_v61  ;;  %v1754_v3 = vld [vmem:[%s2210_s1 + $0x2e8] sm:$0xff]  ;;  %v1770_v62 = vld [vmem:[%s2210_s1 + $0x2e0] sm:$0xff]  ;;  %vm457_vm8 = vcmask 1041409   ;;  %vm459_vm9 = vcmask 80896   ;;  %s1124_s28 = sshll.u32 %s2216_s7, 4  ;;  %s1125_s28 = int_to_ptr.hbm [resolvable:$true] %s1124_s28 }
  0x28   :  { %248 = vmatpush.msrb.mxu1 %v1732_v46  ;;  %163 = vmatmul.f32.vlgmr.msra.gmra.mxu0 %v125_v54  ;;  %v126_v4 = vld [vmem:[%s2209_s0 + $0x8] sm:$0xff]  ;;  %v1765_v54 = vld [vmem:[%s2210_s1 + $0x258] sm:$0xff] }
  0x29   :  { %223 = vmatmul.f32.vlgmr.msra.gmra.mxu3 %v128_v0  ;;  %311 = vmatpush.msra.mxu2 %v1355_v8  ;;  %v1783_v8 = vld [vmem:[%s2210_s1 + $0x2d8] sm:$0xff]  ;;  %v1928_v0 = vld [vmem:[%s2210_s1 + $0x288] sm:$0xff] }
  0x2a   :  { %292 = vmatpush.msrb.mxu3 %v1350_v7  ;;  %230 = vmatpush.msrb.mxu0 %v1748_v53  ;;  %v1778_v7 = vld [vmem:[%s2210_s1 + $0x250] sm:$0xff] }
  0x2b   :  { %249 = vmatpush.msrb.mxu1 %v1754_v3  ;;  %312 = vmatpush.msra.mxu2 %v1379_v12  ;;  %v1797_v12 = vld [vmem:[%s2210_s1 + $0x2d0] sm:$0xff] }
  0x2c   :  { %183 = vmatmul.f32.vlgmr.msra.gmra.mxu1 %v126_v4  ;;  %293 = vmatpush.msrb.mxu3 %v1374_v11  ;;  %v1792_v11 = vld [vmem:[%s2210_s1 + $0x248] sm:$0xff] }
  0x2d   :  { %231 = vmatpush.msrb.mxu0 %v1765_v54  ;;  %250 = vmatpush.msrb.mxu1 %v1770_v62  ;;  %v130_v4 = vld [vmem:[%s2209_s0 + $0x28] sm:$0xff] }
  0x2e   :  { %294 = vmatpush.msrb.mxu3 %v1403_v16  ;;  %313 = vmatpush.msra.mxu2 %v1396_v15  ;;  %v1806_v15 = vld [vmem:[%s2210_s1 + $0x240] sm:$0xff]  ;;  %v1811_v16 = vld [vmem:[%s2210_s1 + $0x2c8] sm:$0xff] }
  0x2f   :  { %232 = vmatpush.msrb.mxu0 %v1778_v7  ;;  %251 = vmatpush.msrb.mxu1 %v1783_v8 }
  0x30   :  { %295 = vmatpush.msrb.mxu3 %v1427_v20  ;;  %314 = vmatpush.msra.mxu2 %v1420_v19  ;;  %v1820_v19 = vld [vmem:[%s2210_s1 + $0x238] sm:$0xff]  ;;  %v1825_v20 = vld [vmem:[%s2210_s1 + $0x2c0] sm:$0xff] }
  0x31   :  { %233 = vmatpush.msrb.mxu0 %v1792_v11  ;;  %252 = vmatpush.msrb.mxu1 %v1797_v12 }
  0x32   :  { %296 = vmatpush.msrb.mxu3 %v1451_v24  ;;  %315 = vmatpush.msra.mxu2 %v1444_v23  ;;  %v1834_v23 = vld [vmem:[%s2210_s1 + $0x230] sm:$0xff]  ;;  %v1839_v24 = vld [vmem:[%s2210_s1 + $0x2b8] sm:$0xff] }
  0x33   :  { %234 = vmatpush.msrb.mxu0 %v1806_v15  ;;  %253 = vmatpush.msrb.mxu1 %v1811_v16 }
  0x34   :  { %297 = vmatpush.msrb.mxu3 %v1475_v28  ;;  %316 = vmatpush.msra.mxu2 %v1468_v27  ;;  %v1848_v27 = vld [vmem:[%s2210_s1 + $0x228] sm:$0xff]  ;;  %v1853_v28 = vld [vmem:[%s2210_s1 + $0x2b0] sm:$0xff] }
  0x35   :  { %235 = vmatpush.msrb.mxu0 %v1820_v19  ;;  %254 = vmatpush.msrb.mxu1 %v1825_v20 }
  0x36   :  { %298 = vmatpush.msrb.mxu3 %v1499_v32  ;;  %317 = vmatpush.msra.mxu2 %v1492_v31  ;;  %v1862_v31 = vld [vmem:[%s2210_s1 + $0x220] sm:$0xff]  ;;  %v1867_v32 = vld [vmem:[%s2210_s1 + $0x2a8] sm:$0xff] }
  0x37   :  { %236 = vmatpush.msrb.mxu0 %v1834_v23  ;;  %255 = vmatpush.msrb.mxu1 %v1839_v24 }
  0x38   :  { %299 = vmatpush.msrb.mxu3 %v1523_v36  ;;  %318 = vmatpush.msra.mxu2 %v1516_v35  ;;  %v1876_v35 = vld [vmem:[%s2210_s1 + $0x218] sm:$0xff]  ;;  %v1881_v36 = vld [vmem:[%s2210_s1 + $0x2a0] sm:$0xff] }
  0x39   :  { %237 = vmatpush.msrb.mxu0 %v1848_v27  ;;  %256 = vmatpush.msrb.mxu1 %v1853_v28 }
  0x3a   :  { %300 = vmatpush.msrb.mxu3 %v1547_v40  ;;  %319 = vmatpush.msra.mxu2 %v1540_v39  ;;  %v1890_v39 = vld [vmem:[%s2210_s1 + $0x210] sm:$0xff]  ;;  %v1895_v40 = vld [vmem:[%s2210_s1 + $0x298] sm:$0xff] }
  0x3b   :  { %238 = vmatpush.msrb.mxu0 %v1862_v31  ;;  %257 = vmatpush.msrb.mxu1 %v1867_v32 }
  0x3c   :  { %301 = vmatpush.msrb.mxu3 %v1571_v44  ;;  %320 = vmatpush.msra.mxu2 %v1564_v43  ;;  %v1904_v43 = vld [vmem:[%s2210_s1 + $0x208] sm:$0xff]  ;;  %v1909_v44 = vld [vmem:[%s2210_s1 + $0x290] sm:$0xff] }
  0x3d   :  { %239 = vmatpush.msrb.mxu0 %v1876_v35  ;;  %258 = vmatpush.msrb.mxu1 %v1881_v36 }
  0x3e   :  { %302 = vmatpush.msrb.mxu3 %v1595_v48  ;;  %321 = vmatpush.msra.mxu2 %v1588_v47  ;;  %v131_v48 = vld [vmem:[%s2209_s0 + $0x30] sm:$0xff]  ;;  %v1921_v47 = vld [vmem:[%s2210_s1 + $0x200] sm:$0xff] }
  0x3f   :  { %240 = vmatpush.msrb.mxu0 %v1890_v39  ;;  %259 = vmatpush.msrb.mxu1 %v1895_v40 }
  0x40   :  { %303 = vmatpush.msrb.mxu3 %v1619_v52  ;;  %322 = vmatpush.msra.mxu2 %v1612_v51  ;;  %v129_v52 = vld [vmem:[%s2209_s0 + $0x20] sm:$0xff] }
  0x41   :  { %241 = vmatpush.msrb.mxu0 %v1904_v43  ;;  %260 = vmatpush.msrb.mxu1 %v1909_v44  ;;  %v1940_v51 = vld [vmem:[%s2210_s1 + $0x280] sm:$0xff] }
  0x42   :  { %1133 = vmatmul.msk.f32.vlgmr.msrb.gmra.mxu2 %vm143_vm0, %v131_v48  ;;  %304 = vmatpush.msrb.mxu3 %v1643_v56 }
  0x43   :  { %323 = vmatpush.msra.mxu2 %v1636_v55  ;;  %242 = vmatpush.msrb.mxu0 %v1921_v47 }
  0x44   :  { %261 = vmatpush.msrb.mxu1 %v1928_v0  ;;  %243 = vmatmul.f32.vlgmr.msrb.gmra.mxu0 %v129_v52 }
  0x45   :  { %305 = vmatpush.msrb.mxu3 %v1667_v60  ;;  %324 = vmatpush.msra.mxu2 %v1660_v59 }
  0x46   :  { %262 = vmatpush.msrb.mxu1 %v1940_v51  ;;  %330 = vmatpush.msra.mxu0 %v1316_v1  ;;  %v132_v1 = vld [vmem:[%s2209_s0 + $0x38] sm:$0xff] }
  0x47   :  { %370 = vmatpush.msra.mxu3 %v1684_v63  ;;  %263 = vmatmul.f32.vlgmr.msrb.gmra.mxu1 %v130_v4 }
  0x48   :  { %325 = vmatpush.msra.mxu2 %v1696_v57  ;;  %350 = vmatpush.msra.mxu1 %v1321_v2  ;;  %v133_v2 = vld [vmem:[%s2209_s0 + $0x40] sm:$0xff] }
  0x49   :  { %371 = vmatpush.msra.mxu3 %v1703_v58  ;;  %331 = vmatpush.msra.mxu0 %v1338_v5  ;;  %v2237_v5 = vld [vmem:[#allocation5_spill] sm:$0xff] }
  0x4a   :  { %390 = vmatpush.msrb.mxu2 %v1710_v50  ;;  %351 = vmatpush.msra.mxu1 %v1345_v6  ;;  %v2238_v6 = vld [vmem:[#allocation7_spill] sm:$0xff] }
  0x4b   :  { %372 = vmatpush.msra.mxu3 %v1725_v61  ;;  %332 = vmatpush.msra.mxu0 %v1362_v9  ;;  %v2239_v9 = vld [vmem:[#allocation6_spill] sm:$0xff] }
  0x4c   :  { %391 = vmatpush.msrb.mxu2 %v1732_v46  ;;  %352 = vmatpush.msra.mxu1 %v1367_v10  ;;  %v136_v10 = vld [vmem:[%s2209_s0 + $0x58] sm:$0xff] }
  0x4d   :  { %373 = vmatpush.msra.mxu3 %v1748_v53  ;;  %333 = vmatpush.msra.mxu0 %v1384_v13  ;;  %v2240_v13 = vld [vmem:[#allocation9_spill] sm:$0xff] }
  0x4e   :  { %392 = vmatpush.msrb.mxu2 %v1754_v3  ;;  %353 = vmatpush.msra.mxu1 %v1391_v14  ;;  %v2241_v14 = vld [vmem:[#allocation8_spill] sm:$0xff] }
  0x4f   :  { %374 = vmatpush.msra.mxu3 %v1765_v54  ;;  %334 = vmatpush.msra.mxu0 %v1408_v17  ;;  %v134_v17 = vld [vmem:[%s2209_s0 + $0x48] sm:$0xff]  ;;  %v1266_v54 = vmov 0.0  }
  0x50   :  { %393 = vmatpush.msrb.mxu2 %v1770_v62  ;;  %354 = vmatpush.msra.mxu1 %v1415_v18  ;;  %v137_v18 = vld [vmem:[%s2209_s0 + $0x60] sm:$0xff] }
  0x51   :  { %375 = vmatpush.msra.mxu3 %v1778_v7  ;;  %335 = vmatpush.msra.mxu0 %v1432_v21  ;;  %v2242_v21 = vld [vmem:[#allocation11_spill] sm:$0xff] }
  0x52   :  { %394 = vmatpush.msrb.mxu2 %v1783_v8  ;;  %355 = vmatpush.msra.mxu1 %v1439_v22  ;;  %v2243_v22 = vld [vmem:[#allocation10_spill] sm:$0xff] }
  0x53   :  { %376 = vmatpush.msra.mxu3 %v1792_v11  ;;  %336 = vmatpush.msra.mxu0 %v1456_v25  ;;  %v135_v25 = vld [vmem:[%s2209_s0 + $0x50] sm:$0xff]  ;;  %v2054_v11 = vld [vmem:[%s2212_s3 + $0x8] sm:$0x3] }
  0x54   :  { %395 = vmatpush.msrb.mxu2 %v1797_v12  ;;  %356 = vmatpush.msra.mxu1 %v1463_v26  ;;  %v2244_v26 = vld [vmem:[#allocation13_spill] sm:$0xff] }
  0x55   :  { %377 = vmatpush.msra.mxu3 %v1806_v15  ;;  %337 = vmatpush.msra.mxu0 %v1480_v29  ;;  %v2245_v29 = vld [vmem:[#allocation12_spill] sm:$0xff] }
  0x56   :  { %396 = vmatpush.msrb.mxu2 %v1811_v16  ;;  %357 = vmatpush.msra.mxu1 %v1487_v30  ;;  %v2246_v30 = vld [vmem:[#allocation14_spill] sm:$0xff]  ;;  %v2059_v12 = vld [vmem:[%s2212_s3] sm:$0xff] }
  0x57   :  { %378 = vmatpush.msra.mxu3 %v1820_v19  ;;  %338 = vmatpush.msra.mxu0 %v1504_v33  ;;  %v138_v33 = vld [vmem:[%s2209_s0 + $0x68] sm:$0xff] }
  0x58   :  { %397 = vmatpush.msrb.mxu2 %v1825_v20  ;;  %358 = vmatpush.msra.mxu1 %v1511_v34  ;;  %v1233_v34 = vld [vmem:[%s2211_s2] ss:$0 sm:$0xff] }
  0x59   :  { %379 = vmatpush.msra.mxu3 %v1834_v23  ;;  %339 = vmatpush.msra.mxu0 %v1528_v37 }
  0x5a   :  { %398 = vmatpush.msrb.mxu2 %v1839_v24  ;;  %359 = vmatpush.msra.mxu1 %v1535_v38 }
  0x5b   :  { %380 = vmatpush.msra.mxu3 %v1848_v27  ;;  %340 = vmatpush.msra.mxu0 %v1552_v41 }
  0x5c   :  { %399 = vmatpush.msrb.mxu2 %v1853_v28  ;;  %306 = vmatmul.f32.vlgmr.msrb.gmra.mxu3 %v132_v1 }
  0x5d   :  { %381 = vmatpush.msra.mxu3 %v1862_v31  ;;  %341 = vmatpush.msra.mxu0 %v1576_v45 }
  0x5e   :  { %400 = vmatpush.msrb.mxu2 %v1867_v32  ;;  %360 = vmatpush.msra.mxu1 %v1559_v42 }
  0x5f   :  { %382 = vmatpush.msra.mxu3 %v1876_v35  ;;  %326 = vmatmul.f32.vlgmr.msra.gmra.mxu2 %v133_v2 }
  0x60   :  { %401 = vmatpush.msrb.mxu2 %v1881_v36  ;;  %342 = vmatpush.msra.mxu0 %v1600_v49 }
  0x61   :  { %361 = vmatpush.msra.mxu1 %v2237_v5  ;;  %383 = vmatpush.msra.mxu3 %v1890_v39 }
  0x62   :  { %402 = vmatpush.msrb.mxu2 %v1895_v40  ;;  %343 = vmatpush.msra.mxu0 %v2238_v6 }
  0x63   :  { %362 = vmatpush.msra.mxu1 %v2239_v9  ;;  %384 = vmatpush.msra.mxu3 %v1904_v43 }
  0x64   :  { %403 = vmatpush.msrb.mxu2 %v1909_v44  ;;  %344 = vmatpush.msra.mxu0 %v2240_v13 }
  0x65   :  { %363 = vmatpush.msra.mxu1 %v2241_v14  ;;  %385 = vmatpush.msra.mxu3 %v1921_v47 }
  0x66   :  { %404 = vmatpush.msrb.mxu2 %v1928_v0  ;;  %386 = vmatmul.f32.vlgmr.msra.gmra.mxu3 %v136_v10 }
  0x67   :  { %345 = vmatpush.msra.mxu0 %v2242_v21  ;;  %364 = vmatpush.msra.mxu1 %v2243_v22 }
  0x68   :  { %405 = vmatpush.msrb.mxu2 %v1940_v51  ;;  %346 = vmatmul.f32.vlgmr.msra.gmra.mxu0 %v134_v17 }
  0x69   :  { %406 = vmatmul.f32.vlgmr.msrb.gmra.mxu2 %v137_v18  ;;  %424 = vmatpush.msrb.mxu0 %v2244_v26 }
  0x6a   :  { %365 = vmatpush.msra.mxu1 %v2245_v29  ;;  %1163 = vmatpush.msk.msra.mxu2 %vm462_vm2, %v2054_v11 }
  0x6b   :  { %366 = vmatmul.f32.vlgmr.msra.gmra.mxu1 %v135_v25  ;;  %425 = vmatpush.msrb.mxu0 %v2246_v30 }
  0x6c   :  { %1139 = vmatpush.msk.msrb.mxu1 %vm462_vm2, %v2054_v11  ;;  %651 = vmatpush.msra.mxu2 %v2059_v12 }
  0x6d   :  { %1151 = vmatpush.msk.msra.mxu0 %vm462_vm2, %v2054_v11 }
  0x6e   :  { %481 = vmatpush.msrb.mxu1 %v2059_v12  ;;  %1187 = vmatpush.msk.msrb.mxu2 %vm462_vm2, %v2054_v11 }
  0x6f   :  { %569 = vmatpush.msra.mxu0 %v2059_v12 }
  0x70   :  { %1134 = vmatmul.msk.f32.vlgmr.msrb.gmra.mxu0 %vm143_vm0, %v138_v33  ;;  %815 = vmatpush.msrb.mxu2 %v2059_v12 }
  0x71   :  { %1175 = vmatpush.msk.msrb.mxu0 %vm462_vm2, %v2054_v11 }
  0x73   :  { %733 = vmatpush.msrb.mxu0 %v2059_v12 }
  0xa5   :  { %v164_v37 = vpop.f32.mrf.mxu0 }
  0xa6   :  { %v165_v38 = vadd.f32 %v1233_v34, %v164_v37 }
  0xa9   :  { %v184_v41 = vpop.f32.mrf.mxu1  ;;  %v204_v45 = vpop.f32.mrf.mxu2 }
  0xaa   :  { %v185_v42 = vadd.f32 %v184_v41, %v165_v38 }
  0xac   :  { %v205_v46 = vadd.f32 %v204_v45, %v185_v42  ;;  %v224_v49 = vpop.f32.mrf.mxu3 }
  0xae   :  { %v225_v50 = vadd.f32 %v224_v49, %v205_v46 }
  0xc1   :  { %v244_v53 = vpop.f32.mrf.mxu0 }
  0xc2   :  { %v245_v55 = vadd.f32 %v244_v53, %v225_v50 }
  0xc4   :  { %v264_v56 = vpop.f32.mrf.mxu1 }
  0xc5   :  { %v265_v57 = vadd.f32 %v264_v56, %v245_v55  ;;  %v284_v58 = vpop.f32.mrf.mxu2 }
  0xc7   :  { %v2041_v59 = vadd.f32 %v284_v58, %v265_v57 }
  0xc9   :  { %v1135_v60 = vadd.f32 -1.0, %v2041_v59  ;;  %v528_v61 = vmul.f32 0.1, %v2041_v59  ;;  %v532_v63 = vrot.slane %v2041_v59, 1  ;;  %v614_v8 = vrot.slane %v2041_v59, 2 }
  0xca   :  { %v696_v28 = vrot.slane %v2041_v59, 3  ;;  %v778_v44 = vrot.slane %v2041_v59, 4  ;;  %v860_v22 = vrot.slane %v2041_v59, 5 }
  0xcb   :  { %vm445_vm1 = vcmp.gt.f32.partialorder %v1135_v60, 0.0  ;;  %v536_v3 = vadd.f32 %v532_v63, %v528_v61 }
  0xcc   :  { %v2047_v62 = vsel %vm445_vm1, 1.0, %v1266_v54 }
  0xcd   :  { %v538_v7 = vsub.f32 %v536_v3, %v2047_v62 }
  0xcf   :  { %v612_v15 = vmul.f32 0.1, %v538_v7  ;;  %v1147_v16 = vadd.f32 -1.0, %v538_v7 }
  0xd1   :  { %v618_v19 = vadd.f32 %v614_v8, %v612_v15  ;;  %vm542_vm3 = vcmp.gt.f32.partialorder %v1147_v16, 0.0  ;;  %v942_v15 = vrot.slane %v2041_v59, 6 }
  0xd2   :  { %v2070_v20 = vsel %vm542_vm3, 1.0, %v1266_v54 }
  0xd3   :  { %v620_v23 = vsub.f32 %v618_v19, %v2070_v20 }
  0xd5   :  { %v694_v24 = vmul.f32 0.1, %v620_v23  ;;  %v1159_v27 = vadd.f32 -1.0, %v620_v23 }
  0xd7   :  { %vm624_vm4 = vcmp.gt.f32.partialorder %v1159_v27, 0.0  ;;  %v700_v31 = vadd.f32 %v696_v28, %v694_v24 }
  0xd8   :  { %v2082_v32 = vsel %vm624_vm4, 1.0, %v1266_v54 }
  0xd9   :  { %v702_v35 = vsub.f32 %v700_v31, %v2082_v32 }
  0xdb   :  { %v1171_v36 = vadd.f32 -1.0, %v702_v35  ;;  %v776_v40 = vmul.f32 0.1, %v702_v35 }
  0xdd   :  { %vm706_vm5 = vcmp.gt.f32.partialorder %v1171_v36, 0.0  ;;  %v782_v0 = vadd.f32 %v778_v44, %v776_v40 }
  0xde   :  { %v2087_v51 = vsel %vm706_vm5, 1.0, %v1266_v54 }
  0xdf   :  { %v307_v39 = vpop.f32.mrf.mxu3  ;;  %v784_v2 = vsub.f32 %v782_v0, %v2087_v51 }
  0xe0   :  { %v308_v43 = vadd.f32 %v1233_v34, %v307_v39 }
  0xe1   :  { %v1183_v13 = vadd.f32 -1.0, %v784_v2  ;;  %v858_v18 = vmul.f32 0.1, %v784_v2 }
  0xe2   :  { %v327_v48 = vpop.f32.mrf.mxu2 }
  0xe3   :  { %v328_v47 = vadd.f32 %v327_v48, %v308_v43  ;;  %vm788_vm6 = vcmp.gt.f32.partialorder %v1183_v13, 0.0  ;;  %v864_v30 = vadd.f32 %v860_v22, %v858_v18 }
  0xe4   :  { %v2097_v34 = vsel %vm788_vm6, 1.0, %v1266_v54 }
  0xe5   :  { %v347_v52 = vpop.f32.mrf.mxu0  ;;  %v866_v42 = vsub.f32 %v864_v30, %v2097_v34 }
  0xe6   :  { %v348_v4 = vadd.f32 %v347_v52, %v328_v47 }
  0xe7   :  { %v1195_v58 = vadd.f32 -1.0, %v866_v42 }
  0xe8   :  { %v367_v1 = vpop.f32.mrf.mxu1 }
  0xe9   :  { %v368_v5 = vadd.f32 %v367_v1, %v348_v4  ;;  %v387_v6 = vpop.f32.mrf.mxu3  ;;  %vm870_vm12 = vcmp.gt.f32.partialorder %v1195_v58, 0.0 }
  0xeb   :  { %v388_v9 = vadd.f32 %v387_v6, %v368_v5 }
  0xec   :  { %v407_v10 = vpop.f32.mrf.mxu2 }
  0xed   :  { %v408_v14 = vadd.f32 %v407_v10, %v388_v9  ;;  %v427_v17 = vpop.f32.mrf.mxu0 }
  0xef   :  { %v2090_v21 = vadd.f32 %v427_v17, %v408_v14 }
  0xf1   :  { %v1136_v25 = vadd.f32 -1.0, %v2090_v21  ;;  %v529_v26 = vmul.f32 0.1, %v2090_v21  ;;  %v533_v29 = vrot.slane %v2090_v21, 1  ;;  %v615_v50 = vrot.slane %v2090_v21, 2 }
  0xf2   :  { %v697_v3 = vrot.slane %v2090_v21, 3  ;;  %v779_v31 = vrot.slane %v2090_v21, 4  ;;  %v861_v47 = vrot.slane %v2090_v21, 5  ;;  %v943_v13 = vrot.slane %v2090_v21, 6 }
  0xf3   :  { %vm446_vm7 = vcmp.gt.f32.partialorder %v1136_v25, 0.0  ;;  %v537_v33 = vadd.f32 %v533_v29, %v529_v26 }
  0xf4   :  { %v1138_v37 = vsel %vm446_vm7, 1.0, %v1266_v54 }
  0xf5   :  { %v456_v38 = vrot.slane %v1138_v37, 7  ;;  %v539_v41 = vsub.f32 %v537_v33, %v1138_v37 }
  0xf7   :  { %v458_v45 = vsel %vm457_vm8, %v456_v38, %v2047_v62  ;;  %v613_v46 = vmul.f32 0.1, %v539_v41  ;;  %v1148_v49 = vadd.f32 -1.0, %v539_v41  ;;  %v940_v62 = vmul.f32 0.1, %v866_v42 }
  0xf8   :  { %1140 = vmatmul.msk.f32.vlgmr.msrb.gmra.mxu1 %vm459_vm9, %v458_v45 }
  0xf9   :  { %vm543_vm10 = vcmp.gt.f32.partialorder %v1148_v49, 0.0  ;;  %v619_v53 = vadd.f32 %v615_v50, %v613_v46  ;;  %v946_v23 = vadd.f32 %v942_v15, %v940_v62 }
  0xfa   :  { %v1150_v55 = vsel %vm543_vm10, 1.0, %v1266_v54 }
  0xfb   :  { %v550_v56 = vrot.slane %v1150_v55, 7  ;;  %v621_v57 = vsub.f32 %v619_v53, %v1150_v55  ;;  %v434_v53 = vld [vmem:[%s2214_s5 + $0x8] sm:$0x3]  ;;  %v433_v55 = vld [vmem:[%s2214_s5] sm:$0xff] }
  0xfc   :  { %1143 = vmatpush.msk.msrb.mxu3 %vm462_vm2, %v434_v53  ;;  %1155 = vmatpush.msk.msra.mxu1 %vm462_vm2, %v434_v53 }
  0xfd   :  { %v551_v60 = vsel %vm457_vm8, %v550_v56, %v2070_v20  ;;  %v695_v61 = vmul.f32 0.1, %v621_v57  ;;  %v1160_v63 = vadd.f32 -1.0, %v621_v57  ;;  %v1197_v20 = vsel %vm870_vm12, 1.0, %v1266_v54  ;;  %v2162_v56 = vld [vmem:[%s2213_s4] ss:$0 sm:$0xff] }
  0xfe   :  { %1152 = vmatmul.msk.f32.vlgmr.msra.gmra.mxu0 %vm459_vm9, %v551_v60  ;;  %v948_v39 = vsub.f32 %v946_v23, %v1197_v20  ;;  %516 = vmatpush.msrb.mxu3 %v433_v55 }
  0xff   :  { %vm625_vm11 = vcmp.gt.f32.partialorder %v1160_v63, 0.0  ;;  %v701_v7 = vadd.f32 %v697_v3, %v695_v61  ;;  %1199 = vmatpush.msk.msra.mxu0 %vm462_vm2, %v2054_v11  ;;  %599 = vmatpush.msra.mxu1 %v433_v55 }
 0x100   :  { %v1162_v8 = vsel %vm625_vm11, 1.0, %v1266_v54  ;;  %v1207_v0 = vadd.f32 -1.0, %v948_v39  ;;  %v1022_v5 = vmul.f32 0.1, %v948_v39  ;;  %1167 = vmatpush.msk.msra.mxu3 %vm462_vm2, %v434_v53 }
 0x101   :  { %v632_v16 = vrot.slane %v1162_v8, 7  ;;  %v703_v19 = vsub.f32 %v701_v7, %v1162_v8  ;;  %897 = vmatpush.msra.mxu0 %v2059_v12  ;;  %1179 = vmatpush.msk.msrb.mxu1 %vm462_vm2, %v434_v53 }
 0x102   :  { %vm952_vm15 = vcmp.gt.f32.partialorder %v1207_v0, 0.0  ;;  %681 = vmatpush.msra.mxu3 %v433_v55 }
 0x103   :  { %v633_v24 = vsel %vm457_vm8, %v632_v16, %v2082_v32  ;;  %v777_v27 = vmul.f32 0.1, %v703_v19  ;;  %v1172_v28 = vadd.f32 -1.0, %v703_v19  ;;  %v1209_v18 = vsel %vm952_vm15, 1.0, %v1266_v54  ;;  %763 = vmatpush.msrb.mxu1 %v433_v55 }
 0x104   :  { %1164 = vmatmul.msk.f32.vlgmr.msra.gmra.mxu2 %vm459_vm9, %v633_v24 }
 0x105   :  { %vm707_vm13 = vcmp.gt.f32.partialorder %v1172_v28, 0.0  ;;  %v783_v35 = vadd.f32 %v779_v31, %v777_v27  ;;  %1211 = vmatpush.msk.msra.mxu2 %vm462_vm2, %v2054_v11 }
 0x106   :  { %v1174_v36 = vsel %vm707_vm13, 1.0, %v1266_v54 }
 0x107   :  { %v714_v40 = vrot.slane %v1174_v36, 7  ;;  %v785_v43 = vsub.f32 %v783_v35, %v1174_v36  ;;  %979 = vmatpush.msra.mxu2 %v2059_v12 }
 0x109   :  { %v715_v32 = vsel %vm457_vm8, %v714_v40, %v2087_v51  ;;  %v859_v44 = vmul.f32 0.1, %v785_v43  ;;  %v1184_v48 = vadd.f32 -1.0, %v785_v43  ;;  %v1024_v51 = vrot.slane %v2041_v59, 7 }
 0x10a   :  { %1176 = vmatmul.msk.f32.vlgmr.msrb.gmra.mxu0 %vm459_vm9, %v715_v32  ;;  %v1025_v59 = vrot.slane %v2090_v21, 7 }
 0x10b   :  { %vm789_vm14 = vcmp.gt.f32.partialorder %v1184_v48, 0.0  ;;  %v865_v52 = vadd.f32 %v861_v47, %v859_v44  ;;  %1223 = vmatpush.msk.msrb.mxu0 %vm462_vm2, %v2054_v11  ;;  %v1028_v14 = vadd.f32 %v1024_v51, %v1022_v5 }
 0x10c   :  { %v1186_v4 = vsel %vm789_vm14, 1.0, %v1266_v54 }
 0x10d   :  { %v796_v1 = vrot.slane %v1186_v4, 7  ;;  %v867_v2 = vsub.f32 %v865_v52, %v1186_v4  ;;  %1061 = vmatpush.msrb.mxu0 %v2059_v12  ;;  %v1030_v30 = vsub.f32 %v1028_v14, %v1209_v18 }
 0x10f   :  { %v797_v6 = vsel %vm457_vm8, %v796_v1, %v2097_v34  ;;  %v941_v9 = vmul.f32 0.1, %v867_v2  ;;  %v1196_v10 = vadd.f32 -1.0, %v867_v2  ;;  %v1219_v41 = vadd.f32 -1.0, %v1030_v30 }
 0x110   :  { %1188 = vmatmul.msk.f32.vlgmr.msrb.gmra.mxu2 %vm459_vm9, %v797_v6 }
 0x111   :  { %vm871_vm0 = vcmp.gt.f32.partialorder %v1196_v10, 0.0  ;;  %v947_v11 = vadd.f32 %v943_v13, %v941_v9  ;;  %vm1034_vm3 = vcmp.gt.f32.partialorder %v1219_v41, 0.0  ;;  %v1235_v41 = vld [vmem:[%s2215_s6] ss:$0 sm:$0xff]  ;;  %s1267_s6 = smov [#allocation2]  }
 0x112   :  { %v1198_v17 = vsel %vm871_vm0, 1.0, %v1266_v54  ;;  %v1221_v49 = vsel %vm1034_vm3, 1.0, %v1266_v54  ;;  %s1122_s26 = sshll.u32 %s1267_s6, 4  ;;  %s1123_s26 = int_to_ptr.vmem [resolvable:$true] %s1122_s26 }
 0x113   :  { %v878_v12 = vrot.slane %v1198_v17, 7  ;;  %v949_v22 = vsub.f32 %v947_v11, %v1198_v17 }
 0x115   :  { %v879_v25 = vsel %vm457_vm8, %v878_v12, %v1197_v20  ;;  %v1023_v26 = vmul.f32 0.1, %v949_v22  ;;  %v1208_v29 = vadd.f32 -1.0, %v949_v22 }
 0x116   :  { %1200 = vmatmul.msk.f32.vlgmr.msra.gmra.mxu0 %vm459_vm9, %v879_v25 }
 0x117   :  { %vm953_vm1 = vcmp.gt.f32.partialorder %v1208_v29, 0.0  ;;  %v1029_v33 = vadd.f32 %v1025_v59, %v1023_v26 }
 0x118   :  { %v1210_v34 = vsel %vm953_vm1, 1.0, %v1266_v54 }
 0x119   :  { %v960_v37 = vrot.slane %v1210_v34, 7  ;;  %v1031_v38 = vsub.f32 %v1029_v33, %v1210_v34 }
 0x11b   :  { %v961_v42 = vsel %vm457_vm8, %v960_v37, %v1209_v18  ;;  %v1220_v45 = vadd.f32 -1.0, %v1031_v38 }
 0x11c   :  { %1212 = vmatmul.msk.f32.vlgmr.msra.gmra.mxu2 %vm459_vm9, %v961_v42 }
 0x11d   :  { %vm1035_vm4 = vcmp.gt.f32.partialorder %v1220_v45, 0.0 }
 0x11e   :  { %v1222_v21 = vsel %vm1035_vm4, 1.0, %v1266_v54 }
 0x11f   :  { %v1042_v46 = vrot.slane %v1222_v21, 7 }
 0x121   :  { %v1043_v50 = vsel %vm457_vm8, %v1042_v46, %v1221_v49 }
 0x122   :  { %1224 = vmatmul.msk.f32.vlgmr.msrb.gmra.mxu0 %vm459_vm9, %v1043_v50 }
 0x175   :  { %v483_v57 = vpop.f32.mrf.mxu1 }
 0x176   :  { %v484_v58 = vadd.f32 %v2162_v56, %v483_v57 }
 0x178   :  { %v1141_v60 = vadd.f32 -1.0, %v484_v58  ;;  %v574_v3 = vmul.f32 0.1, %v484_v58 }
 0x17a   :  { %vm489_vm5 = vcmp.gt.f32.partialorder %v1141_v60, 0.0 }
 0x17b   :  { %v1142_v61 = vsel %vm489_vm5, 1.0, %v1266_v54  ;;  %v571_v63 = vpop.f32.mrf.mxu0  ;;  %vm1104_vm5 = vcmask 74752  }
 0x17c   :  { %v572_v62 = vadd.f32 %v2162_v56, %v571_v63  ;;  %1144 = vmatmul.msk.f32.vlgmr.msrb.gmra.mxu3 %vm459_vm9, %v1142_v61 }
 0x17d   :  { %1191 = vmatpush.msk.msrb.mxu3 %vm462_vm2, %v434_v53 }
 0x17e   :  { %v575_v7 = vadd.f32 %v574_v3, %v572_v62 }
 0x17f   :  { %845 = vmatpush.msrb.mxu3 %v433_v55 }
 0x180   :  { %v576_v8 = vsub.f32 %v575_v7, %v1142_v61 }
 0x182   :  { %v1153_v15 = vadd.f32 -1.0, %v576_v8  ;;  %v656_v23 = vmul.f32 0.1, %v576_v8 }
 0x184   :  { %vm578_vm6 = vcmp.gt.f32.partialorder %v1153_v15, 0.0 }
 0x185   :  { %v1154_v16 = vsel %vm578_vm6, 1.0, %v1266_v54 }
 0x186   :  { %1156 = vmatmul.msk.f32.vlgmr.msra.gmra.mxu1 %vm459_vm9, %v1154_v16 }
 0x187   :  { %v653_v19 = vpop.f32.mrf.mxu2  ;;  %1203 = vmatpush.msk.msra.mxu1 %vm462_vm2, %v434_v53  ;;  %v735_v27 = vpop.f32.mrf.mxu0 }
 0x188   :  { %v654_v20 = vadd.f32 %v2162_v56, %v653_v19  ;;  %v736_v35 = vadd.f32 %v2162_v56, %v735_v27 }
 0x189   :  { %927 = vmatpush.msra.mxu1 %v433_v55 }
 0x18a   :  { %v657_v24 = vadd.f32 %v656_v23, %v654_v20 }
 0x18c   :  { %v658_v28 = vsub.f32 %v657_v24, %v1154_v16 }
 0x18e   :  { %v1165_v31 = vadd.f32 -1.0, %v658_v28  ;;  %v738_v36 = vmul.f32 0.1, %v658_v28 }
 0x190   :  { %vm660_vm7 = vcmp.gt.f32.partialorder %v1165_v31, 0.0  ;;  %v739_v39 = vadd.f32 %v738_v36, %v736_v35 }
 0x191   :  { %v1166_v40 = vsel %vm660_vm7, 1.0, %v1266_v54 }
 0x192   :  { %v740_v43 = vsub.f32 %v739_v39, %v1166_v40  ;;  %1168 = vmatmul.msk.f32.vlgmr.msra.gmra.mxu3 %vm459_vm9, %v1166_v40 }
 0x193   :  { %v817_v32 = vpop.f32.mrf.mxu2  ;;  %1215 = vmatpush.msk.msra.mxu3 %vm462_vm2, %v434_v53  ;;  %v899_v4 = vpop.f32.mrf.mxu0 }
 0x194   :  { %v1177_v44 = vadd.f32 -1.0, %v740_v43  ;;  %v818_v48 = vadd.f32 %v2162_v56, %v817_v32  ;;  %v820_v47 = vmul.f32 0.1, %v740_v43  ;;  %v900_v5 = vadd.f32 %v2162_v56, %v899_v4 }
 0x195   :  { %1009 = vmatpush.msra.mxu3 %v433_v55 }
 0x196   :  { %vm742_vm8 = vcmp.gt.f32.partialorder %v1177_v44, 0.0  ;;  %v821_v0 = vadd.f32 %v820_v47, %v818_v48 }
 0x197   :  { %v1178_v52 = vsel %vm742_vm8, 1.0, %v1266_v54 }
 0x198   :  { %v822_v1 = vsub.f32 %v821_v0, %v1178_v52  ;;  %1180 = vmatmul.msk.f32.vlgmr.msrb.gmra.mxu1 %vm459_vm9, %v1178_v52 }
 0x199   :  { %1227 = vmatpush.msk.msrb.mxu1 %vm462_vm2, %v434_v53 }
 0x19a   :  { %v1189_v2 = vadd.f32 -1.0, %v822_v1  ;;  %v902_v51 = vmul.f32 0.1, %v822_v1 }
 0x19b   :  { %1091 = vmatpush.msrb.mxu1 %v433_v55 }
 0x19c   :  { %vm824_vm10 = vcmp.gt.f32.partialorder %v1189_v2, 0.0  ;;  %v903_v6 = vadd.f32 %v902_v51, %v900_v5 }
 0x19d   :  { %v1190_v9 = vsel %vm824_vm10, 1.0, %v1266_v54 }
 0x19e   :  { %v904_v10 = vsub.f32 %v903_v6, %v1190_v9  ;;  %1192 = vmatmul.msk.f32.vlgmr.msrb.gmra.mxu3 %vm459_vm9, %v1190_v9 }
 0x19f   :  { %v981_v13 = vpop.f32.mrf.mxu2  ;;  %v1063_v22 = vpop.f32.mrf.mxu0 }
 0x1a0   :  { %v1201_v11 = vadd.f32 -1.0, %v904_v10  ;;  %v982_v14 = vadd.f32 %v2162_v56, %v981_v13  ;;  %v984_v17 = vmul.f32 0.1, %v904_v10  ;;  %v1064_v26 = vadd.f32 %v2162_v56, %v1063_v22 }
 0x1a2   :  { %vm906_vm11 = vcmp.gt.f32.partialorder %v1201_v11, 0.0  ;;  %v985_v18 = vadd.f32 %v984_v17, %v982_v14 }
 0x1a3   :  { %v1202_v12 = vsel %vm906_vm11, 1.0, %v1266_v54 }
 0x1a4   :  { %v986_v59 = vsub.f32 %v985_v18, %v1202_v12  ;;  %1204 = vmatmul.msk.f32.vlgmr.msra.gmra.mxu1 %vm459_vm9, %v1202_v12 }
 0x1a6   :  { %v1213_v25 = vadd.f32 -1.0, %v986_v59  ;;  %v1066_v29 = vmul.f32 0.1, %v986_v59 }
 0x1a8   :  { %vm988_vm2 = vcmp.gt.f32.partialorder %v1213_v25, 0.0  ;;  %v1067_v30 = vadd.f32 %v1066_v29, %v1064_v26 }
 0x1a9   :  { %v1214_v33 = vsel %vm988_vm2, 1.0, %v1266_v54 }
 0x1aa   :  { %v1068_v34 = vsub.f32 %v1067_v30, %v1214_v33  ;;  %1216 = vmatmul.msk.f32.vlgmr.msra.gmra.mxu3 %vm459_vm9, %v1214_v33 }
 0x1ac   :  { %v1225_v37 = vadd.f32 -1.0, %v1068_v34 }
 0x1ae   :  { %vm1070_vm12 = vcmp.gt.f32.partialorder %v1225_v37, 0.0 }
 0x1af   :  { %v1226_v38 = vsel %vm1070_vm12, 1.0, %v1266_v54 }
 0x1b0   :  { %1228 = vmatmul.msk.f32.vlgmr.msrb.gmra.mxu1 %vm459_vm9, %v1226_v38 }
 0x1ff   :  { %v518_v42 = vpop.f32.mrf.mxu3 }
 0x200   :  { %v519_v45 = vadd.f32 %v1235_v41, %v518_v42 }
 0x202   :  { %v1145_v46 = vadd.f32 -1.0, %v519_v45  ;;  %v604_v50 = vmul.f32 0.1, %v519_v45 }
 0x203   :  { %v601_v21 = vpop.f32.mrf.mxu1 }
 0x204   :  { %v602_v49 = vadd.f32 %v1235_v41, %v601_v21  ;;  %vm524_vm13 = vcmp.gt.f32.partialorder %v1145_v46, 0.0 }
 0x205   :  { %v1146_v55 = vsel %vm524_vm13, 1.0, %v1266_v54 }
 0x206   :  { %v605_v53 = vadd.f32 %v604_v50, %v602_v49 }
 0x208   :  { %v606_v56 = vsub.f32 %v605_v53, %v1146_v55 }
 0x20a   :  { %v1157_v57 = vadd.f32 -1.0, %v606_v56  ;;  %v686_v61 = vmul.f32 0.1, %v606_v56 }
 0x20c   :  { %vm608_vm14 = vcmp.gt.f32.partialorder %v1157_v57, 0.0 }
 0x20d   :  { %v1158_v3 = vsel %vm608_vm14, 1.0, %v1266_v54 }
 0x20e   :  { %v611_v9 = vadd.f32 %v1158_v3, %v1146_v55 }
 0x215   :  { %v683_v58 = vpop.f32.mrf.mxu3  ;;  %v765_v62 = vpop.f32.mrf.mxu1 }
 0x216   :  { %v684_v60 = vadd.f32 %v1235_v41, %v683_v58  ;;  %v766_v15 = vadd.f32 %v1235_v41, %v765_v62 }
 0x218   :  { %v687_v63 = vadd.f32 %v686_v61, %v684_v60 }
 0x21a   :  { %v688_v7 = vsub.f32 %v687_v63, %v1158_v3 }
 0x21c   :  { %v1169_v8 = vadd.f32 -1.0, %v688_v7  ;;  %v768_v16 = vmul.f32 0.1, %v688_v7 }
 0x21e   :  { %vm690_vm9 = vcmp.gt.f32.partialorder %v1169_v8, 0.0  ;;  %v769_v19 = vadd.f32 %v768_v16, %v766_v15 }
 0x21f   :  { %v1170_v20 = vsel %vm690_vm9, 1.0, %v1266_v54 }
 0x220   :  { %v770_v23 = vsub.f32 %v769_v19, %v1170_v20  ;;  %v693_v13 = vadd.f32 %v1170_v20, %v611_v9 }
 0x221   :  { %v847_v24 = vpop.f32.mrf.mxu3  ;;  %v929_v39 = vpop.f32.mrf.mxu1 }
 0x222   :  { %v1181_v27 = vadd.f32 -1.0, %v770_v23  ;;  %v848_v28 = vadd.f32 %v1235_v41, %v847_v24  ;;  %v850_v31 = vmul.f32 0.1, %v770_v23  ;;  %v930_v32 = vadd.f32 %v1235_v41, %v929_v39 }
 0x224   :  { %vm772_vm15 = vcmp.gt.f32.partialorder %v1181_v27, 0.0  ;;  %v851_v35 = vadd.f32 %v850_v31, %v848_v28 }
 0x225   :  { %v1182_v36 = vsel %vm772_vm15, 1.0, %v1266_v54 }
 0x226   :  { %v852_v40 = vsub.f32 %v851_v35, %v1182_v36  ;;  %v775_v18 = vadd.f32 %v1182_v36, %v693_v13 }
 0x228   :  { %v1193_v43 = vadd.f32 -1.0, %v852_v40  ;;  %v932_v44 = vmul.f32 0.1, %v852_v40 }
 0x22a   :  { %vm854_vm0 = vcmp.gt.f32.partialorder %v1193_v43, 0.0  ;;  %v933_v48 = vadd.f32 %v932_v44, %v930_v32 }
 0x22b   :  { %v1194_v47 = vsel %vm854_vm0, 1.0, %v1266_v54 }
 0x22c   :  { %v934_v0 = vsub.f32 %v933_v48, %v1194_v47  ;;  %v857_v59 = vadd.f32 %v1194_v47, %v775_v18 }
 0x22d   :  { %v1011_v52 = vpop.f32.mrf.mxu3  ;;  %v1093_v6 = vpop.f32.mrf.mxu1 }
 0x22e   :  { %v1205_v4 = vadd.f32 -1.0, %v934_v0  ;;  %v1012_v1 = vadd.f32 %v1235_v41, %v1011_v52  ;;  %v1014_v2 = vmul.f32 0.1, %v934_v0  ;;  %v1094_v14 = vadd.f32 %v1235_v41, %v1093_v6 }
 0x230   :  { %vm936_vm1 = vcmp.gt.f32.partialorder %v1205_v4, 0.0  ;;  %v1015_v5 = vadd.f32 %v1014_v2, %v1012_v1 }
 0x231   :  { %v1206_v51 = vsel %vm936_vm1, 1.0, %v1266_v54 }
 0x232   :  { %v1016_v10 = vsub.f32 %v1015_v5, %v1206_v51  ;;  %v939_v26 = vadd.f32 %v1206_v51, %v857_v59 }
 0x234   :  { %v1217_v11 = vadd.f32 -1.0, %v1016_v10  ;;  %v1096_v17 = vmul.f32 0.1, %v1016_v10 }
 0x236   :  { %vm1018_vm3 = vcmp.gt.f32.partialorder %v1217_v11, 0.0  ;;  %v1097_v12 = vadd.f32 %v1096_v17, %v1094_v14 }
 0x237   :  { %v1218_v22 = vsel %vm1018_vm3, 1.0, %v1266_v54 }
 0x238   :  { %v1098_v25 = vsub.f32 %v1097_v12, %v1218_v22  ;;  %v1021_v30 = vadd.f32 %v1218_v22, %v939_v26 }
 0x23a   :  { %v1229_v29 = vadd.f32 -1.0, %v1098_v25 }
 0x23c   :  { %vm1100_vm4 = vcmp.gt.f32.partialorder %v1229_v29, 0.0 }
 0x23d   :  { %v1230_v33 = vsel %vm1100_vm4, 1.0, %v1266_v54 }
 0x23e   :  { %v1103_v34 = vadd.f32 %v1230_v33, %v1021_v30 }
 0x240   :  { %v1105_v37 = vsel %vm1104_vm5, %v1103_v34, -inf }
 0x241   :  { %1106 = vmax.xlane.f32.xlu0 %v1105_v37 }
 0x2b4   :  { %v1107_v38 = vpop.xlane.xlu0 %1106 }
 0x2b5   :  { %v1108_v41 = vsub.f32 %v1103_v34, %v1107_v38 }
 0x2b7   :  { %v1109_v42 = vmul.f32 1.442695, %v1108_v41 }
 0x2b9   :  { %1236 = vpow2.f32 %v1109_v42 }
 0x2bf   :  { %v1237_v45 = vpop.eup %1236 }
 0x2c0   :  { %v1111_v21 = vsel %vm1104_vm5, %v1237_v45, 0.0 }
 0x2c1   :  { %1112 = vadd.xlane.f32.xlu0 %v1111_v21 }
 0x334   :  { %v1113_v46 = vpop.xlane.xlu0 %1112 }
 0x335   :  { %1238 = vrcp.f32 %v1113_v46 }
 0x33b   :  { %v1239_v54 = vpop.eup %1238 }
 0x33c   :  { %v1115_v49 = vmul.f32 %v1239_v54, %v1237_v45 }
 0x33e   :  { %1116 = vst.msk [vmem:[#allocation2] sm:$0x3] %vm1104_vm5, %v1115_v49 }
 0x33f   :  { %1127 = dma.vmem_to_hbm [thread:$0]  %s1123_s26, 32, %s1125_s28, [#allocation3]  }
 0x340   :  { %1264 = dma.done.wait [#allocation3], 32  }
 0x341   :  { %1265 = vsyncadd [#allocation3], 4294967264 }
 0x342   :  { %1132 = vsyncpa [#allocation3], 1 }

</bundles_post_ra>
